<compile_context>
chip_gen: v7x
topology: tpu7x:2x2x1
jax: 0.10.0
libtpu: 0.0.40
codegen_flags: <defaults>
</compile_context>

<pallas_src>
import math

import jax
import jax.numpy as jnp
import numpy as np
from jax.experimental import pallas as pl
from jax.experimental.pallas import tpu as pltpu

# ----------------------- small synthetic PWGAN generator hyper-params -----------------------
T_FEATS = 256                # mel frames
AUX_CH = 8                   # n_mels
SCALES = (2, 2)              # upsample scales -> hop_size = 4
HOP = int(np.prod(SCALES))
T_WAV = T_FEATS * HOP        # 1024
RES_CH = 8                   # residual channels
GATE_CH = 16                 # gate channels (split in half for tanh / sigmoid)
SKIP_CH = 8                  # skip channels
LAYERS = 4
DILATIONS = (1, 2, 4, 8)
KSIZE = 3                    # dilated conv kernel size
SQRT_HALF = math.sqrt(0.5)
SKIP_SCALE = math.sqrt(1.0 / LAYERS)

FUSED_IN = KSIZE * RES_CH + AUX_CH    # 32 : [x(t-d); x(t); x(t+d); c]
# ---- time-grid tiling ----
T_B = 512                    # output block (multiple of 256 lanes for the v6e/v7x MXU)
PAD = 128                    # per-side recompute halo, lane-aligned
T_EXT = T_B + 2 * PAD        # extended block width the WaveNet is evaluated on

assert T_WAV % T_B == 0 and T_B % 128 == 0
assert PAD >= sum(DILATIONS)          # halo must cover the full receptive field of the block


def _shift_time(x, off):
    """result[:, t] = x[:, t + off] with zero padding (one tap of a 'same' dilated conv)."""
    C, T = x.shape
    if off == 0:
        return x
    if off > 0:
        return jnp.concatenate([x[:, off:], jnp.zeros((C, off), x.dtype)], axis=1)
    k = -off
    return jnp.concatenate([jnp.zeros((C, k), x.dtype), x[:, : T - k]], axis=1)


# ------------------------------------ Pallas kernel ------------------------------------
def pwgan_wavenet_kernel(zc_ref, wg_ref, wo_ref, lc1w_ref, head_ref, o_ref, slab_scr, g_scr):
    # --- block-local view: central T_B samples + PAD halo on each side ---
    t0 = pl.multiple_of(pl.program_id(0) * T_B, 128)
    zc = zc_ref[:, pl.ds(t0, T_EXT)]            # (AUX+1, T_EXT) f32 (from the PAD-padded stream)
    c = zc[:AUX_CH]                             # upsampled conditioning
    z = zc[AUX_CH:AUX_CH + 1]                   # noise

    head = head_ref[...]                        # (RES_CH, 5) f32
    first_w = head[:, 0:1]
    first_b = head[:, 1:2]
    lc1_b = head[:, 2:3]
    lc2_w = head[:, 3:4]
    lc2_b = head[0:1, 4:5]

    # Global-sample validity: local column j maps to global sample t0 - PAD + j.  Taps that the
    # reference zero-pads (global < 0 or >= T_WAV) are reproduced by zeroing the residual stream
    # at invalid columns each layer.  (Block-local roll wrap only pollutes columns within
    # sum(DILATIONS) < PAD of the block edge, which never reach the emitted central region.)
    lane = jax.lax.broadcasted_iota(jnp.int32, (RES_CH, T_EXT), 1)
    g_idx = lane + (t0 - PAD)
    valid = (g_idx >= 0) & (g_idx < T_WAV)

    # Persistent-scratch rows that do not change inside the layer loop:
    slab_scr[KSIZE * RES_CH:KSIZE * RES_CH + AUX_CH, :] = c                      # conditioning
    slab_scr[FUSED_IN:FUSED_IN + 1, :] = jnp.ones((1, T_EXT), jnp.float32)       # conv-bias row
    g_scr[GATE_CH // 2:GATE_CH // 2 + 1, :] = jnp.ones((1, T_EXT), jnp.float32)  # skip/out-bias row

    # first_conv: Conv1d(1 -> RES_CH, kernel=1) -- contraction dim 1 -> broadcast multiply (VPU)
    x = jnp.where(valid, first_w * z + first_b, 0.0)                             # (RES, T_EXT)

    skips = None
    for l in range(LAYERS):
        d = DILATIONS[l]
        # Only the 3*RES_CH tap rows are rewritten per layer (f32, 8-row-aligned stores).
        slab_scr[0:RES_CH, :] = pltpu.roll(x, d, axis=1)              # x(t-d)
        slab_scr[RES_CH:2 * RES_CH, :] = x                            # x(t)
        slab_scr[2 * RES_CH:3 * RES_CH, :] = pltpu.roll(x, T_EXT - d, axis=1)  # x(t+d)
        # Fused [3 dilated taps || aux 1x1 || conv bias] as ONE bf16 MXU matmul (K = 33).
        y = jnp.dot(wg_ref[l], slab_scr[...].astype(jnp.bfloat16),
                    preferred_element_type=jnp.float32)               # (GATE, T_EXT) f32
        # gated activation; sigmoid as a single EUP tanh push
        g = jnp.tanh(y[:GATE_CH // 2]) * (0.5 + 0.5 * jnp.tanh(0.5 * y[GATE_CH // 2:]))
        g_scr[0:GATE_CH // 2, :] = g
        # Fused [skip 1x1 ; out 1x1 ; biases] as one bf16 matmul.
        so = jnp.dot(wo_ref[l], g_scr[...].astype(jnp.bfloat16),
                     preferred_element_type=jnp.float32)              # (SKIP+RES, T_EXT) f32
        s = so[:SKIP_CH]
        o = so[SKIP_CH:]
        x = jnp.where(valid, (x + o) * SQRT_HALF, 0.0)                # residual (f32 path)
        skips = s if skips is None else skips + s

    h = jnp.maximum(skips * SKIP_SCALE, 0.0)                                     # ReLU
    h = jnp.dot(lc1w_ref[...], h.astype(jnp.bfloat16),
                preferred_element_type=jnp.float32) + lc1_b
    h = jnp.maximum(h, 0.0)
    # Final (1 x SKIP_CH) conv: VPU multiply + sublane (XLU) reduce -- keep M=1 off the MXU.
    wav = jnp.sum(lc2_w * h, axis=0, keepdims=True) + lc2_b                      # (1, T_EXT)
    o_ref[...] = wav[:, PAD:PAD + T_B]                                           # central block


# ------------------------------------ JAX glue ------------------------------------
def make_conditioning(feats, params):
    """normalize_before + ConvInUpsampleNetwork (glue): returns (AUX_CH, T_WAV)."""
    c = (feats - params["mean"]) / params["scale"]           # (T_feats, AUX)
    c = c.T                                                  # (AUX, T_feats)
    c = params["conv_in_w"] @ c                              # 1x1 conv_in, bias=False
    for s in SCALES:
        c = jnp.repeat(c, s, axis=-1)                        # nearest "stretch"
        k = jnp.full((2 * s + 1,), 1.0 / (2 * s + 1), jnp.float32)   # mean-filter Conv2d init
        c = jax.vmap(lambda row: jnp.convolve(row, k, mode="same"))(c)
    return c


def pack_operands(z, c_up, p):
    """Fuse per-layer weights + biases; cast MXU weight slabs to bf16; pad the zc stream."""
    zc = jnp.concatenate([c_up, z], axis=0)                              # (AUX+1, T_WAV)
    halo = jnp.zeros((AUX_CH + 1, PAD), jnp.float32)
    zc = jnp.concatenate([halo, zc, halo], axis=1)                       # (AUX+1, T_WAV+2*PAD)

    # fused gate weights: [tap(t-d) | tap(t) | tap(t+d) | aux_1x1 | conv_bias] per layer
    wg = jnp.stack([
        jnp.concatenate([p["conv_w"][l * KSIZE + 0],
                         p["conv_w"][l * KSIZE + 1],
                         p["conv_w"][l * KSIZE + 2],
                         p["aux_w"][l],
                         p["conv_b"][l]], axis=1)
        for l in range(LAYERS)]).astype(jnp.bfloat16)                    # (L, GATE, FUSED_IN+1)

    # fused skip/out weights with bias column: rows 0:SKIP = skip, SKIP: = out
    wo = jnp.stack([
        jnp.concatenate([jnp.concatenate([p["skip_w"][l], p["out_w"][l]], axis=0),
                         jnp.concatenate([p["skip_b"][l], p["out_b"][l]], axis=0)], axis=1)
        for l in range(LAYERS)]).astype(jnp.bfloat16)                    # (L, SKIP+RES, GATE//2+1)

    lc1w = p["lc1_w"].astype(jnp.bfloat16)                               # (SKIP, SKIP) bf16

    head = jnp.concatenate([
        p["first_w"], p["first_b"], p["lc1_b"], p["lc2_w"].T,
        jnp.pad(p["lc2_b"], ((0, RES_CH - 1), (0, 0))),
    ], axis=1)                                                           # (RES, 5) f32
    return zc, wg, wo, lc1w, head


def pwgan_vocoder(feats, z, params):
    c_up = make_conditioning(feats, params)
    zc, wg, wo, lc1w, head = pack_operands(z, c_up, params)

    def resident(shape):
        return pl.BlockSpec(shape, lambda t, _n=len(shape): (0,) * _n)   # DMA'd once, VMEM-resident

    grid_spec = pltpu.PrefetchScalarGridSpec(
        num_scalar_prefetch=0,
        grid=(T_WAV // T_B,),
        in_specs=[
            resident(zc.shape),      # padded z||c stream (small; kernel slices its own halo window)
            resident(wg.shape),
            resident(wo.shape),
            resident(lc1w.shape),
            resident(head.shape),
        ],
        out_specs=pl.BlockSpec((1, T_B), lambda t: (0, t)),              # lane-dense output blocks
        scratch_shapes=[
            pltpu.VMEM((FUSED_IN + 1, T_EXT), jnp.float32),              # persistent matmul slab
            pltpu.VMEM((GATE_CH // 2 + 1, T_EXT), jnp.float32),          # gate output + ones row
        ],
    )
    wav = pl.pallas_call(
        pwgan_wavenet_kernel,
        out_shape=jax.ShapeDtypeStruct((1, T_WAV), jnp.float32),
        grid_spec=grid_spec,
        compiler_params=pltpu.CompilerParams(
            dimension_semantics=("parallel",),        # blocks are self-contained -> v7x dual TC
            vmem_limit_bytes=32 * 1024 * 1024),
    )(zc, wg, wo, lc1w, head)
    # .view(-1)  ->  (T_wav,)
    return wav.reshape(-1)


# ------------------------------------ pure-JAX reference ------------------------------------
def wavenet_ref(z, c, p):
    x = p["first_w"] * z + p["first_b"]
    skips = jnp.zeros((SKIP_CH, T_WAV), jnp.float32)
    for l in range(LAYERS):
        d = DILATIONS[l]
        acc = jnp.zeros((GATE_CH, T_WAV), jnp.float32)
        for j, off in enumerate((-d, 0, d)):
            acc = acc + p["conv_w"][l * KSIZE + j] @ _shift_time(x, off)
        y = acc + p["conv_b"][l] + p["aux_w"][l] @ c
        g = jnp.tanh(y[: GATE_CH // 2]) * jax.nn.sigmoid(y[GATE_CH // 2:])
        s = p["skip_w"][l] @ g + p["skip_b"][l]
        o = p["out_w"][l] @ g + p["out_b"][l]
        x = (x + o) * SQRT_HALF
        skips = skips + s
    h = jnp.maximum(skips * SKIP_SCALE, 0.0)
    h = jnp.maximum(p["lc1_w"] @ h + p["lc1_b"], 0.0)
    return (p["lc2_w"] @ h + p["lc2_b"]).reshape(-1)


# ------------------------------------ deterministic params ------------------------------------
def init_params(key):
    ks = jax.random.split(key, 11)

    def w(k, shape, scale=0.2):
        return (scale * jax.random.normal(k, shape)).astype(jnp.float32)

    return dict(
        mean=0.1 * jnp.arange(AUX_CH, dtype=jnp.float32),
        scale=1.0 + 0.05 * jnp.arange(AUX_CH, dtype=jnp.float32),
        conv_in_w=w(ks[0], (AUX_CH, AUX_CH)),
        first_w=w(ks[1], (RES_CH, 1)),
        first_b=jnp.zeros((RES_CH, 1), jnp.float32),
        conv_w=w(ks[2], (LAYERS * KSIZE, GATE_CH, RES_CH)),
        conv_b=w(ks[3], (LAYERS, GATE_CH, 1), 0.05),
        aux_w=w(ks[4], (LAYERS, GATE_CH, AUX_CH)),
        skip_w=w(ks[5], (LAYERS, SKIP_CH, GATE_CH // 2)),
        skip_b=w(ks[6], (LAYERS, SKIP_CH, 1), 0.05),
        out_w=w(ks[7], (LAYERS, RES_CH, GATE_CH // 2)),
        out_b=w(ks[8], (LAYERS, RES_CH, 1), 0.05),
        lc1_w=w(ks[9], (SKIP_CH, SKIP_CH)),
        lc1_b=jnp.zeros((SKIP_CH, 1), jnp.float32),
        lc2_w=w(ks[10], (1, SKIP_CH)),
        lc2_b=jnp.zeros((1, 1), jnp.float32),
    )


if __name__ == "__main__":
    key = jax.random.PRNGKey(0)
    kf, kz, kp = jax.random.split(key, 3)
    feats = jax.random.normal(kf, (T_FEATS, AUX_CH), jnp.float32)   # (T_feats, n_mels)
    z = jax.random.normal(kz, (1, T_WAV), jnp.float32)              # deterministic noise stand-in
    params = init_params(kp)

    wav = pwgan_vocoder(feats, z, params)
    wav = jax.block_until_ready(wav)

    assert wav.shape == (T_WAV,)
    ref = wavenet_ref(z, make_conditioning(feats, params), params)
    # tolerance widened for bf16 MXU operands (f32 accumulation, f32 nonlinearity path)
    np.testing.assert_allclose(np.asarray(wav), np.asarray(ref), rtol=2e-2, atol=2e-2)
    print("KERNEL_OK")
</pallas_src>

<mosaic_0001>
module attributes {stable_mosaic.version = 11 : i64} {
  func.func @pwgan_wavenet_kernel(%arg0: i32, %arg1: memref<9x1280xf32, #tpu.memory_space<vmem>>, %arg2: memref<4x16x33xbf16, #tpu.memory_space<vmem>>, %arg3: memref<4x16x9xbf16, #tpu.memory_space<vmem>>, %arg4: memref<8x8xbf16, #tpu.memory_space<vmem>>, %arg5: memref<8x5xf32, #tpu.memory_space<vmem>>, %arg6: memref<1x512xf32, #tpu.memory_space<vmem>>, %arg7: memref<33x768xf32, #tpu.memory_space<vmem>>, %arg8: memref<9x768xf32, #tpu.memory_space<vmem>>) attributes {dimension_semantics = [#tpu.dimension_semantics<parallel>], iteration_bounds = array<i64: 2>, scalar_prefetch = 0 : i64, scratch_operands = 2 : i64, tpu.core_type = #tpu.core_type<tc>, window_params = [{pipeline_mode = #tpu.pipeline_mode<synchronous>, transform_indices = @transform_0, window_bounds = array<i64: 9, 1280>}, {pipeline_mode = #tpu.pipeline_mode<synchronous>, transform_indices = @transform_1, window_bounds = array<i64: 4, 16, 33>}, {pipeline_mode = #tpu.pipeline_mode<synchronous>, transform_indices = @transform_2, window_bounds = array<i64: 4, 16, 9>}, {pipeline_mode = #tpu.pipeline_mode<synchronous>, transform_indices = @transform_3, window_bounds = array<i64: 8, 8>}, {pipeline_mode = #tpu.pipeline_mode<synchronous>, transform_indices = @transform_4, window_bounds = array<i64: 8, 5>}, {transform_indices = @transform_5, window_bounds = array<i64: 1, 512>}]} {
    %c512_i32 = arith.constant 512 : i32
    %0 = arith.muli %arg0, %c512_i32 : i32
    %1 = tpu.assume_multiple %0, 128 : i32
    %c0 = arith.constant 0 : index
    %2 = arith.index_cast %1 : i32 to index
    %3 = vector.load %arg1[%c0, %2] : memref<9x1280xf32, #tpu.memory_space<vmem>>, vector<9x768xf32>
    %4 = vector.extract_strided_slice %3 {offsets = [0, 0], sizes = [8, 768], strides = [1, 1]} : vector<9x768xf32> to vector<8x768xf32>
    %5 = vector.extract_strided_slice %3 {offsets = [8, 0], sizes = [1, 768], strides = [1, 1]} : vector<9x768xf32> to vector<1x768xf32>
    %c0_0 = arith.constant 0 : index
    %c0_1 = arith.constant 0 : index
    %6 = vector.load %arg5[%c0_0, %c0_1] : memref<8x5xf32, #tpu.memory_space<vmem>>, vector<8x5xf32>
    %7 = vector.extract_strided_slice %6 {offsets = [0, 0], sizes = [8, 1], strides = [1, 1]} : vector<8x5xf32> to vector<8x1xf32>
    %8 = vector.extract_strided_slice %6 {offsets = [0, 1], sizes = [8, 1], strides = [1, 1]} : vector<8x5xf32> to vector<8x1xf32>
    %9 = vector.extract_strided_slice %6 {offsets = [0, 2], sizes = [8, 1], strides = [1, 1]} : vector<8x5xf32> to vector<8x1xf32>
    %10 = vector.extract_strided_slice %6 {offsets = [0, 3], sizes = [8, 1], strides = [1, 1]} : vector<8x5xf32> to vector<8x1xf32>
    %11 = vector.extract_strided_slice %6 {offsets = [0, 4], sizes = [1, 1], strides = [1, 1]} : vector<8x5xf32> to vector<1x1xf32>
    %12 = tpu.iota {dimensions = array<i32: 1>} : vector<8x768xi32>
    %c128_i32 = arith.constant 128 : i32
    %13 = arith.subi %1, %c128_i32 : i32
    %14 = vector.broadcast %13 : i32 to vector<8x768xi32>
    %15 = arith.addi %12, %14 : vector<8x768xi32>
    %c0_i32 = arith.constant 0 : i32
    %16 = vector.broadcast %c0_i32 : i32 to vector<8x768xi32>
    %17 = arith.cmpi sge, %15, %16 : vector<8x768xi32>
    %c1024_i32 = arith.constant 1024 : i32
    %18 = vector.broadcast %c1024_i32 : i32 to vector<8x768xi32>
    %19 = arith.cmpi slt, %15, %18 : vector<8x768xi32>
    %20 = arith.andi %17, %19 : vector<8x768xi1>
    %c24 = arith.constant 24 : index
    %c0_2 = arith.constant 0 : index
    %21 = vector.load %arg7[%c24, %c0_2] : memref<33x768xf32, #tpu.memory_space<vmem>>, vector<8x768xf32>
    tpu.vector_store %arg7[%c24, %c0_2], %4 {strides = array<i32>} : memref<33x768xf32, #tpu.memory_space<vmem>>, vector<8x768xf32>,
    %cst = arith.constant 1.000000e+00 : f32
    %22 = vector.broadcast %cst : f32 to vector<1x768xf32>
    %c32 = arith.constant 32 : index
    %c0_3 = arith.constant 0 : index
    %23 = vector.load %arg7[%c32, %c0_3] : memref<33x768xf32, #tpu.memory_space<vmem>>, vector<1x768xf32>
    tpu.vector_store %arg7[%c32, %c0_3], %22 {strides = array<i32>} : memref<33x768xf32, #tpu.memory_space<vmem>>, vector<1x768xf32>,
    %cst_4 = arith.constant 1.000000e+00 : f32
    %24 = vector.broadcast %cst_4 : f32 to vector<1x768xf32>
    %c8 = arith.constant 8 : index
    %c0_5 = arith.constant 0 : index
    %25 = vector.load %arg8[%c8, %c0_5] : memref<9x768xf32, #tpu.memory_space<vmem>>, vector<1x768xf32>
    tpu.vector_store %arg8[%c8, %c0_5], %24 {strides = array<i32>} : memref<9x768xf32, #tpu.memory_space<vmem>>, vector<1x768xf32>,
    %26 = vector.broadcast %7 : vector<8x1xf32> to vector<8x768xf32>
    %27 = vector.broadcast %5 : vector<1x768xf32> to vector<8x768xf32>
    %28 = arith.mulf %26, %27 : vector<8x768xf32>
    %29 = vector.broadcast %8 : vector<8x1xf32> to vector<8x768xf32>
    %30 = arith.addf %28, %29 : vector<8x768xf32>
    %cst_6 = arith.constant 0.000000e+00 : f32
    %31 = vector.broadcast %cst_6 : f32 to vector<8x768xf32>
    %32 = arith.select %20, %30, %31 : vector<8x768xi1>, vector<8x768xf32>
    %c1_i32 = arith.constant 1 : i32
    %33 = tpu.dynamic_rotate %32 by %c1_i32 dim 1 : vector<8x768xf32>, i32 -> vector<8x768xf32>
    %c0_7 = arith.constant 0 : index
    %c0_8 = arith.constant 0 : index
    %34 = vector.load %arg7[%c0_7, %c0_8] : memref<33x768xf32, #tpu.memory_space<vmem>>, vector<8x768xf32>
    tpu.vector_store %arg7[%c0_7, %c0_8], %33 {strides = array<i32>} : memref<33x768xf32, #tpu.memory_space<vmem>>, vector<8x768xf32>,
    %c8_9 = arith.constant 8 : index
    %c0_10 = arith.constant 0 : index
    %35 = vector.load %arg7[%c8_9, %c0_10] : memref<33x768xf32, #tpu.memory_space<vmem>>, vector<8x768xf32>
    tpu.vector_store %arg7[%c8_9, %c0_10], %32 {strides = array<i32>} : memref<33x768xf32, #tpu.memory_space<vmem>>, vector<8x768xf32>,
    %c767_i32 = arith.constant 767 : i32
    %36 = tpu.dynamic_rotate %32 by %c767_i32 dim 1 : vector<8x768xf32>, i32 -> vector<8x768xf32>
    %c16 = arith.constant 16 : index
    %c0_11 = arith.constant 0 : index
    %37 = vector.load %arg7[%c16, %c0_11] : memref<33x768xf32, #tpu.memory_space<vmem>>, vector<8x768xf32>
    tpu.vector_store %arg7[%c16, %c0_11], %36 {strides = array<i32>} : memref<33x768xf32, #tpu.memory_space<vmem>>, vector<8x768xf32>,
    %c0_12 = arith.constant 0 : index
    %c0_13 = arith.constant 0 : index
    %c0_14 = arith.constant 0 : index
    %38 = vector.load %arg2[%c0_12, %c0_13, %c0_14] : memref<4x16x33xbf16, #tpu.memory_space<vmem>>, vector<1x16x33xbf16>
    %39 = vector.shape_cast %38 : vector<1x16x33xbf16> to vector<16x33xbf16>
    %c0_15 = arith.constant 0 : index
    %c0_16 = arith.constant 0 : index
    %40 = vector.load %arg7[%c0_15, %c0_16] : memref<33x768xf32, #tpu.memory_space<vmem>>, vector<33x768xf32>
    %41 = arith.truncf %40 : vector<33x768xf32> to vector<33x768xbf16>
    %cst_17 = arith.constant dense<0.000000e+00> : vector<16x768xf32>
    %42 = tpu.matmul %39, %41, %cst_17 {dimension_numbers = #tpu.dot_dimension_numbers<[1], [0], [0], [1], [0, 0, 1, 1], [], []>} : vector<16x33xbf16>, vector<33x768xbf16>, vector<16x768xf32> -> vector<16x768xf32>
    %43 = vector.extract_strided_slice %42 {offsets = [0, 0], sizes = [8, 768], strides = [1, 1]} : vector<16x768xf32> to vector<8x768xf32>
    %44 = math.tanh %43 : vector<8x768xf32>
    %45 = vector.extract_strided_slice %42 {offsets = [8, 0], sizes = [8, 768], strides = [1, 1]} : vector<16x768xf32> to vector<8x768xf32>
    %cst_18 = arith.constant 5.000000e-01 : f32
    %46 = vector.broadcast %cst_18 : f32 to vector<8x768xf32>
    %47 = arith.mulf %46, %45 : vector<8x768xf32>
    %48 = math.tanh %47 : vector<8x768xf32>
    %cst_19 = arith.constant 5.000000e-01 : f32
    %49 = vector.broadcast %cst_19 : f32 to vector<8x768xf32>
    %50 = arith.mulf %49, %48 : vector<8x768xf32>
    %cst_20 = arith.constant 5.000000e-01 : f32
    %51 = vector.broadcast %cst_20 : f32 to vector<8x768xf32>
    %52 = arith.addf %51, %50 : vector<8x768xf32>
    %53 = arith.mulf %44, %52 : vector<8x768xf32>
    %c0_21 = arith.constant 0 : index
    %c0_22 = arith.constant 0 : index
    %54 = vector.load %arg8[%c0_21, %c0_22] : memref<9x768xf32, #tpu.memory_space<vmem>>, vector<8x768xf32>
    tpu.vector_store %arg8[%c0_21, %c0_22], %53 {strides = array<i32>} : memref<9x768xf32, #tpu.memory_space<vmem>>, vector<8x768xf32>,
    %c0_23 = arith.constant 0 : index
    %c0_24 = arith.constant 0 : index
    %c0_25 = arith.constant 0 : index
    %55 = vector.load %arg3[%c0_23, %c0_24, %c0_25] : memref<4x16x9xbf16, #tpu.memory_space<vmem>>, vector<1x16x9xbf16>
    %56 = vector.shape_cast %55 : vector<1x16x9xbf16> to vector<16x9xbf16>
    %c0_26 = arith.constant 0 : index
    %c0_27 = arith.constant 0 : index
    %57 = vector.load %arg8[%c0_26, %c0_27] : memref<9x768xf32, #tpu.memory_space<vmem>>, vector<9x768xf32>
    %58 = arith.truncf %57 : vector<9x768xf32> to vector<9x768xbf16>
    %cst_28 = arith.constant dense<0.000000e+00> : vector<16x768xf32>
    %59 = tpu.matmul %56, %58, %cst_28 {dimension_numbers = #tpu.dot_dimension_numbers<[1], [0], [0], [1], [0, 0, 1, 1], [], []>} : vector<16x9xbf16>, vector<9x768xbf16>, vector<16x768xf32> -> vector<16x768xf32>
    %60 = vector.extract_strided_slice %59 {offsets = [0, 0], sizes = [8, 768], strides = [1, 1]} : vector<16x768xf32> to vector<8x768xf32>
    %61 = vector.extract_strided_slice %59 {offsets = [8, 0], sizes = [8, 768], strides = [1, 1]} : vector<16x768xf32> to vector<8x768xf32>
    %62 = arith.addf %32, %61 : vector<8x768xf32>
    %cst_29 = arith.constant 0.707106769 : f32
    %63 = vector.broadcast %cst_29 : f32 to vector<8x768xf32>
    %64 = arith.mulf %62, %63 : vector<8x768xf32>
    %cst_30 = arith.constant 0.000000e+00 : f32
    %65 = vector.broadcast %cst_30 : f32 to vector<8x768xf32>
    %66 = arith.select %20, %64, %65 : vector<8x768xi1>, vector<8x768xf32>
    %c2_i32 = arith.constant 2 : i32
    %67 = tpu.dynamic_rotate %66 by %c2_i32 dim 1 : vector<8x768xf32>, i32 -> vector<8x768xf32>
    %c0_31 = arith.constant 0 : index
    %c0_32 = arith.constant 0 : index
    %68 = vector.load %arg7[%c0_31, %c0_32] : memref<33x768xf32, #tpu.memory_space<vmem>>, vector<8x768xf32>
    tpu.vector_store %arg7[%c0_31, %c0_32], %67 {strides = array<i32>} : memref<33x768xf32, #tpu.memory_space<vmem>>, vector<8x768xf32>,
    %c8_33 = arith.constant 8 : index
    %c0_34 = arith.constant 0 : index
    %69 = vector.load %arg7[%c8_33, %c0_34] : memref<33x768xf32, #tpu.memory_space<vmem>>, vector<8x768xf32>
    tpu.vector_store %arg7[%c8_33, %c0_34], %66 {strides = array<i32>} : memref<33x768xf32, #tpu.memory_space<vmem>>, vector<8x768xf32>,
    %c766_i32 = arith.constant 766 : i32
    %70 = tpu.dynamic_rotate %66 by %c766_i32 dim 1 : vector<8x768xf32>, i32 -> vector<8x768xf32>
    %c16_35 = arith.constant 16 : index
    %c0_36 = arith.constant 0 : index
    %71 = vector.load %arg7[%c16_35, %c0_36] : memref<33x768xf32, #tpu.memory_space<vmem>>, vector<8x768xf32>
    tpu.vector_store %arg7[%c16_35, %c0_36], %70 {strides = array<i32>} : memref<33x768xf32, #tpu.memory_space<vmem>>, vector<8x768xf32>,
    %c1 = arith.constant 1 : index
    %c0_37 = arith.constant 0 : index
    %c0_38 = arith.constant 0 : index
    %72 = vector.load %arg2[%c1, %c0_37, %c0_38] : memref<4x16x33xbf16, #tpu.memory_space<vmem>>, vector<1x16x33xbf16>
    %73 = vector.shape_cast %72 : vector<1x16x33xbf16> to vector<16x33xbf16>
    %c0_39 = arith.constant 0 : index
    %c0_40 = arith.constant 0 : index
    %74 = vector.load %arg7[%c0_39, %c0_40] : memref<33x768xf32, #tpu.memory_space<vmem>>, vector<33x768xf32>
    %75 = arith.truncf %74 : vector<33x768xf32> to vector<33x768xbf16>
    %cst_41 = arith.constant dense<0.000000e+00> : vector<16x768xf32>
    %76 = tpu.matmul %73, %75, %cst_41 {dimension_numbers = #tpu.dot_dimension_numbers<[1], [0], [0], [1], [0, 0, 1, 1], [], []>} : vector<16x33xbf16>, vector<33x768xbf16>, vector<16x768xf32> -> vector<16x768xf32>
    %77 = vector.extract_strided_slice %76 {offsets = [0, 0], sizes = [8, 768], strides = [1, 1]} : vector<16x768xf32> to vector<8x768xf32>
    %78 = math.tanh %77 : vector<8x768xf32>
    %79 = vector.extract_strided_slice %76 {offsets = [8, 0], sizes = [8, 768], strides = [1, 1]} : vector<16x768xf32> to vector<8x768xf32>
    %cst_42 = arith.constant 5.000000e-01 : f32
    %80 = vector.broadcast %cst_42 : f32 to vector<8x768xf32>
    %81 = arith.mulf %80, %79 : vector<8x768xf32>
    %82 = math.tanh %81 : vector<8x768xf32>
    %cst_43 = arith.constant 5.000000e-01 : f32
    %83 = vector.broadcast %cst_43 : f32 to vector<8x768xf32>
    %84 = arith.mulf %83, %82 : vector<8x768xf32>
    %cst_44 = arith.constant 5.000000e-01 : f32
    %85 = vector.broadcast %cst_44 : f32 to vector<8x768xf32>
    %86 = arith.addf %85, %84 : vector<8x768xf32>
    %87 = arith.mulf %78, %86 : vector<8x768xf32>
    %c0_45 = arith.constant 0 : index
    %c0_46 = arith.constant 0 : index
    %88 = vector.load %arg8[%c0_45, %c0_46] : memref<9x768xf32, #tpu.memory_space<vmem>>, vector<8x768xf32>
    tpu.vector_store %arg8[%c0_45, %c0_46], %87 {strides = array<i32>} : memref<9x768xf32, #tpu.memory_space<vmem>>, vector<8x768xf32>,
    %c1_47 = arith.constant 1 : index
    %c0_48 = arith.constant 0 : index
    %c0_49 = arith.constant 0 : index
    %89 = vector.load %arg3[%c1_47, %c0_48, %c0_49] : memref<4x16x9xbf16, #tpu.memory_space<vmem>>, vector<1x16x9xbf16>
    %90 = vector.shape_cast %89 : vector<1x16x9xbf16> to vector<16x9xbf16>
    %c0_50 = arith.constant 0 : index
    %c0_51 = arith.constant 0 : index
    %91 = vector.load %arg8[%c0_50, %c0_51] : memref<9x768xf32, #tpu.memory_space<vmem>>, vector<9x768xf32>
    %92 = arith.truncf %91 : vector<9x768xf32> to vector<9x768xbf16>
    %cst_52 = arith.constant dense<0.000000e+00> : vector<16x768xf32>
    %93 = tpu.matmul %90, %92, %cst_52 {dimension_numbers = #tpu.dot_dimension_numbers<[1], [0], [0], [1], [0, 0, 1, 1], [], []>} : vector<16x9xbf16>, vector<9x768xbf16>, vector<16x768xf32> -> vector<16x768xf32>
    %94 = vector.extract_strided_slice %93 {offsets = [0, 0], sizes = [8, 768], strides = [1, 1]} : vector<16x768xf32> to vector<8x768xf32>
    %95 = vector.extract_strided_slice %93 {offsets = [8, 0], sizes = [8, 768], strides = [1, 1]} : vector<16x768xf32> to vector<8x768xf32>
    %96 = arith.addf %66, %95 : vector<8x768xf32>
    %cst_53 = arith.constant 0.707106769 : f32
    %97 = vector.broadcast %cst_53 : f32 to vector<8x768xf32>
    %98 = arith.mulf %96, %97 : vector<8x768xf32>
    %cst_54 = arith.constant 0.000000e+00 : f32
    %99 = vector.broadcast %cst_54 : f32 to vector<8x768xf32>
    %100 = arith.select %20, %98, %99 : vector<8x768xi1>, vector<8x768xf32>
    %101 = arith.addf %60, %94 : vector<8x768xf32>
    %c4_i32 = arith.constant 4 : i32
    %102 = tpu.dynamic_rotate %100 by %c4_i32 dim 1 : vector<8x768xf32>, i32 -> vector<8x768xf32>
    %c0_55 = arith.constant 0 : index
    %c0_56 = arith.constant 0 : index
    %103 = vector.load %arg7[%c0_55, %c0_56] : memref<33x768xf32, #tpu.memory_space<vmem>>, vector<8x768xf32>
    tpu.vector_store %arg7[%c0_55, %c0_56], %102 {strides = array<i32>} : memref<33x768xf32, #tpu.memory_space<vmem>>, vector<8x768xf32>,
    %c8_57 = arith.constant 8 : index
    %c0_58 = arith.constant 0 : index
    %104 = vector.load %arg7[%c8_57, %c0_58] : memref<33x768xf32, #tpu.memory_space<vmem>>, vector<8x768xf32>
    tpu.vector_store %arg7[%c8_57, %c0_58], %100 {strides = array<i32>} : memref<33x768xf32, #tpu.memory_space<vmem>>, vector<8x768xf32>,
    %c764_i32 = arith.constant 764 : i32
    %105 = tpu.dynamic_rotate %100 by %c764_i32 dim 1 : vector<8x768xf32>, i32 -> vector<8x768xf32>
    %c16_59 = arith.constant 16 : index
    %c0_60 = arith.constant 0 : index
    %106 = vector.load %arg7[%c16_59, %c0_60] : memref<33x768xf32, #tpu.memory_space<vmem>>, vector<8x768xf32>
    tpu.vector_store %arg7[%c16_59, %c0_60], %105 {strides = array<i32>} : memref<33x768xf32, #tpu.memory_space<vmem>>, vector<8x768xf32>,
    %c2 = arith.constant 2 : index
    %c0_61 = arith.constant 0 : index
    %c0_62 = arith.constant 0 : index
    %107 = vector.load %arg2[%c2, %c0_61, %c0_62] : memref<4x16x33xbf16, #tpu.memory_space<vmem>>, vector<1x16x33xbf16>
    %108 = vector.shape_cast %107 : vector<1x16x33xbf16> to vector<16x33xbf16>
    %c0_63 = arith.constant 0 : index
    %c0_64 = arith.constant 0 : index
    %109 = vector.load %arg7[%c0_63, %c0_64] : memref<33x768xf32, #tpu.memory_space<vmem>>, vector<33x768xf32>
    %110 = arith.truncf %109 : vector<33x768xf32> to vector<33x768xbf16>
    %cst_65 = arith.constant dense<0.000000e+00> : vector<16x768xf32>
    %111 = tpu.matmul %108, %110, %cst_65 {dimension_numbers = #tpu.dot_dimension_numbers<[1], [0], [0], [1], [0, 0, 1, 1], [], []>} : vector<16x33xbf16>, vector<33x768xbf16>, vector<16x768xf32> -> vector<16x768xf32>
    %112 = vector.extract_strided_slice %111 {offsets = [0, 0], sizes = [8, 768], strides = [1, 1]} : vector<16x768xf32> to vector<8x768xf32>
    %113 = math.tanh %112 : vector<8x768xf32>
    %114 = vector.extract_strided_slice %111 {offsets = [8, 0], sizes = [8, 768], strides = [1, 1]} : vector<16x768xf32> to vector<8x768xf32>
    %cst_66 = arith.constant 5.000000e-01 : f32
    %115 = vector.broadcast %cst_66 : f32 to vector<8x768xf32>
    %116 = arith.mulf %115, %114 : vector<8x768xf32>
    %117 = math.tanh %116 : vector<8x768xf32>
    %cst_67 = arith.constant 5.000000e-01 : f32
    %118 = vector.broadcast %cst_67 : f32 to vector<8x768xf32>
    %119 = arith.mulf %118, %117 : vector<8x768xf32>
    %cst_68 = arith.constant 5.000000e-01 : f32
    %120 = vector.broadcast %cst_68 : f32 to vector<8x768xf32>
    %121 = arith.addf %120, %119 : vector<8x768xf32>
    %122 = arith.mulf %113, %121 : vector<8x768xf32>
    %c0_69 = arith.constant 0 : index
    %c0_70 = arith.constant 0 : index
    %123 = vector.load %arg8[%c0_69, %c0_70] : memref<9x768xf32, #tpu.memory_space<vmem>>, vector<8x768xf32>
    tpu.vector_store %arg8[%c0_69, %c0_70], %122 {strides = array<i32>} : memref<9x768xf32, #tpu.memory_space<vmem>>, vector<8x768xf32>,
    %c2_71 = arith.constant 2 : index
    %c0_72 = arith.constant 0 : index
    %c0_73 = arith.constant 0 : index
    %124 = vector.load %arg3[%c2_71, %c0_72, %c0_73] : memref<4x16x9xbf16, #tpu.memory_space<vmem>>, vector<1x16x9xbf16>
    %125 = vector.shape_cast %124 : vector<1x16x9xbf16> to vector<16x9xbf16>
    %c0_74 = arith.constant 0 : index
    %c0_75 = arith.constant 0 : index
    %126 = vector.load %arg8[%c0_74, %c0_75] : memref<9x768xf32, #tpu.memory_space<vmem>>, vector<9x768xf32>
    %127 = arith.truncf %126 : vector<9x768xf32> to vector<9x768xbf16>
    %cst_76 = arith.constant dense<0.000000e+00> : vector<16x768xf32>
    %128 = tpu.matmul %125, %127, %cst_76 {dimension_numbers = #tpu.dot_dimension_numbers<[1], [0], [0], [1], [0, 0, 1, 1], [], []>} : vector<16x9xbf16>, vector<9x768xbf16>, vector<16x768xf32> -> vector<16x768xf32>
    %129 = vector.extract_strided_slice %128 {offsets = [0, 0], sizes = [8, 768], strides = [1, 1]} : vector<16x768xf32> to vector<8x768xf32>
    %130 = vector.extract_strided_slice %128 {offsets = [8, 0], sizes = [8, 768], strides = [1, 1]} : vector<16x768xf32> to vector<8x768xf32>
    %131 = arith.addf %100, %130 : vector<8x768xf32>
    %cst_77 = arith.constant 0.707106769 : f32
    %132 = vector.broadcast %cst_77 : f32 to vector<8x768xf32>
    %133 = arith.mulf %131, %132 : vector<8x768xf32>
    %cst_78 = arith.constant 0.000000e+00 : f32
    %134 = vector.broadcast %cst_78 : f32 to vector<8x768xf32>
    %135 = arith.select %20, %133, %134 : vector<8x768xi1>, vector<8x768xf32>
    %136 = arith.addf %101, %129 : vector<8x768xf32>
    %c8_i32 = arith.constant 8 : i32
    %137 = tpu.dynamic_rotate %135 by %c8_i32 dim 1 : vector<8x768xf32>, i32 -> vector<8x768xf32>
    %c0_79 = arith.constant 0 : index
    %c0_80 = arith.constant 0 : index
    %138 = vector.load %arg7[%c0_79, %c0_80] : memref<33x768xf32, #tpu.memory_space<vmem>>, vector<8x768xf32>
    tpu.vector_store %arg7[%c0_79, %c0_80], %137 {strides = array<i32>} : memref<33x768xf32, #tpu.memory_space<vmem>>, vector<8x768xf32>,
    %c8_81 = arith.constant 8 : index
    %c0_82 = arith.constant 0 : index
    %139 = vector.load %arg7[%c8_81, %c0_82] : memref<33x768xf32, #tpu.memory_space<vmem>>, vector<8x768xf32>
    tpu.vector_store %arg7[%c8_81, %c0_82], %135 {strides = array<i32>} : memref<33x768xf32, #tpu.memory_space<vmem>>, vector<8x768xf32>,
    %c760_i32 = arith.constant 760 : i32
    %140 = tpu.dynamic_rotate %135 by %c760_i32 dim 1 : vector<8x768xf32>, i32 -> vector<8x768xf32>
    %c16_83 = arith.constant 16 : index
    %c0_84 = arith.constant 0 : index
    %141 = vector.load %arg7[%c16_83, %c0_84] : memref<33x768xf32, #tpu.memory_space<vmem>>, vector<8x768xf32>
    tpu.vector_store %arg7[%c16_83, %c0_84], %140 {strides = array<i32>} : memref<33x768xf32, #tpu.memory_space<vmem>>, vector<8x768xf32>,
    %c3 = arith.constant 3 : index
    %c0_85 = arith.constant 0 : index
    %c0_86 = arith.constant 0 : index
    %142 = vector.load %arg2[%c3, %c0_85, %c0_86] : memref<4x16x33xbf16, #tpu.memory_space<vmem>>, vector<1x16x33xbf16>
    %143 = vector.shape_cast %142 : vector<1x16x33xbf16> to vector<16x33xbf16>
    %c0_87 = arith.constant 0 : index
    %c0_88 = arith.constant 0 : index
    %144 = vector.load %arg7[%c0_87, %c0_88] : memref<33x768xf32, #tpu.memory_space<vmem>>, vector<33x768xf32>
    %145 = arith.truncf %144 : vector<33x768xf32> to vector<33x768xbf16>
    %cst_89 = arith.constant dense<0.000000e+00> : vector<16x768xf32>
    %146 = tpu.matmul %143, %145, %cst_89 {dimension_numbers = #tpu.dot_dimension_numbers<[1], [0], [0], [1], [0, 0, 1, 1], [], []>} : vector<16x33xbf16>, vector<33x768xbf16>, vector<16x768xf32> -> vector<16x768xf32>
    %147 = vector.extract_strided_slice %146 {offsets = [0, 0], sizes = [8, 768], strides = [1, 1]} : vector<16x768xf32> to vector<8x768xf32>
    %148 = math.tanh %147 : vector<8x768xf32>
    %149 = vector.extract_strided_slice %146 {offsets = [8, 0], sizes = [8, 768], strides = [1, 1]} : vector<16x768xf32> to vector<8x768xf32>
    %cst_90 = arith.constant 5.000000e-01 : f32
    %150 = vector.broadcast %cst_90 : f32 to vector<8x768xf32>
    %151 = arith.mulf %150, %149 : vector<8x768xf32>
    %152 = math.tanh %151 : vector<8x768xf32>
    %cst_91 = arith.constant 5.000000e-01 : f32
    %153 = vector.broadcast %cst_91 : f32 to vector<8x768xf32>
    %154 = arith.mulf %153, %152 : vector<8x768xf32>
    %cst_92 = arith.constant 5.000000e-01 : f32
    %155 = vector.broadcast %cst_92 : f32 to vector<8x768xf32>
    %156 = arith.addf %155, %154 : vector<8x768xf32>
    %157 = arith.mulf %148, %156 : vector<8x768xf32>
    %c0_93 = arith.constant 0 : index
    %c0_94 = arith.constant 0 : index
    %158 = vector.load %arg8[%c0_93, %c0_94] : memref<9x768xf32, #tpu.memory_space<vmem>>, vector<8x768xf32>
    tpu.vector_store %arg8[%c0_93, %c0_94], %157 {strides = array<i32>} : memref<9x768xf32, #tpu.memory_space<vmem>>, vector<8x768xf32>,
    %c3_95 = arith.constant 3 : index
    %c0_96 = arith.constant 0 : index
    %c0_97 = arith.constant 0 : index
    %159 = vector.load %arg3[%c3_95, %c0_96, %c0_97] : memref<4x16x9xbf16, #tpu.memory_space<vmem>>, vector<1x16x9xbf16>
    %160 = vector.shape_cast %159 : vector<1x16x9xbf16> to vector<16x9xbf16>
    %c0_98 = arith.constant 0 : index
    %c0_99 = arith.constant 0 : index
    %161 = vector.load %arg8[%c0_98, %c0_99] : memref<9x768xf32, #tpu.memory_space<vmem>>, vector<9x768xf32>
    %162 = arith.truncf %161 : vector<9x768xf32> to vector<9x768xbf16>
    %cst_100 = arith.constant dense<0.000000e+00> : vector<16x768xf32>
    %163 = tpu.matmul %160, %162, %cst_100 {dimension_numbers = #tpu.dot_dimension_numbers<[1], [0], [0], [1], [0, 0, 1, 1], [], []>} : vector<16x9xbf16>, vector<9x768xbf16>, vector<16x768xf32> -> vector<16x768xf32>
    %164 = vector.extract_strided_slice %163 {offsets = [0, 0], sizes = [8, 768], strides = [1, 1]} : vector<16x768xf32> to vector<8x768xf32>
    %165 = arith.addf %136, %164 : vector<8x768xf32>
    %cst_101 = arith.constant 5.000000e-01 : f32
    %166 = vector.broadcast %cst_101 : f32 to vector<8x768xf32>
    %167 = arith.mulf %165, %166 : vector<8x768xf32>
    %cst_102 = arith.constant 0.000000e+00 : f32
    %168 = vector.broadcast %cst_102 : f32 to vector<8x768xf32>
    %169 = arith.maximumf %167, %168 : vector<8x768xf32>
    %c0_103 = arith.constant 0 : index
    %c0_104 = arith.constant 0 : index
    %170 = vector.load %arg4[%c0_103, %c0_104] : memref<8x8xbf16, #tpu.memory_space<vmem>>, vector<8x8xbf16>
    %171 = arith.truncf %169 : vector<8x768xf32> to vector<8x768xbf16>
    %cst_105 = arith.constant dense<0.000000e+00> : vector<8x768xf32>
    %172 = tpu.matmul %170, %171, %cst_105 {dimension_numbers = #tpu.dot_dimension_numbers<[1], [0], [0], [1], [0, 0, 1, 1], [], []>} : vector<8x8xbf16>, vector<8x768xbf16>, vector<8x768xf32> -> vector<8x768xf32>
    %173 = vector.broadcast %9 : vector<8x1xf32> to vector<8x768xf32>
    %174 = arith.addf %172, %173 : vector<8x768xf32>
    %cst_106 = arith.constant 0.000000e+00 : f32
    %175 = vector.broadcast %cst_106 : f32 to vector<8x768xf32>
    %176 = arith.maximumf %174, %175 : vector<8x768xf32>
    %177 = vector.broadcast %10 : vector<8x1xf32> to vector<8x768xf32>
    %178 = arith.mulf %177, %176 : vector<8x768xf32>
    %cst_107 = arith.constant dense<0.000000e+00> : vector<768xf32>
    %179 = vector.multi_reduction <add>, %178, %cst_107 [0] : vector<8x768xf32> to vector<768xf32>
    %180 = vector.shape_cast %179 : vector<768xf32> to vector<1x768xf32>
    %181 = vector.broadcast %11 : vector<1x1xf32> to vector<1x768xf32>
    %182 = arith.addf %180, %181 : vector<1x768xf32>
    %183 = vector.extract_strided_slice %182 {offsets = [0, 128], sizes = [1, 512], strides = [1, 1]} : vector<1x768xf32> to vector<1x512xf32>
    %c0_108 = arith.constant 0 : index
    %c0_109 = arith.constant 0 : index
    %184 = vector.load %arg6[%c0_108, %c0_109] : memref<1x512xf32, #tpu.memory_space<vmem>>, vector<1x512xf32>
    tpu.vector_store %arg6[%c0_108, %c0_109], %183 {strides = array<i32>} : memref<1x512xf32, #tpu.memory_space<vmem>>, vector<1x512xf32>,
    return
  }
  func.func @transform_0(%arg0: i32) -> (i32, i32) {
    %c0_i32 = arith.constant 0 : i32
    %c0_i32_0 = arith.constant 0 : i32
    %c0_i32_1 = arith.constant 0 : i32
    return %c0_i32, %c0_i32_0 : i32, i32
  }
  func.func @transform_1(%arg0: i32) -> (i32, i32, i32) {
    %c0_i32 = arith.constant 0 : i32
    %c0_i32_0 = arith.constant 0 : i32
    %c0_i32_1 = arith.constant 0 : i32
    %c0_i32_2 = arith.constant 0 : i32
    return %c0_i32, %c0_i32_0, %c0_i32_1 : i32, i32, i32
  }
  func.func @transform_2(%arg0: i32) -> (i32, i32, i32) {
    %c0_i32 = arith.constant 0 : i32
    %c0_i32_0 = arith.constant 0 : i32
    %c0_i32_1 = arith.constant 0 : i32
    %c0_i32_2 = arith.constant 0 : i32
    return %c0_i32, %c0_i32_0, %c0_i32_1 : i32, i32, i32
  }
  func.func @transform_3(%arg0: i32) -> (i32, i32) {
    %c0_i32 = arith.constant 0 : i32
    %c0_i32_0 = arith.constant 0 : i32
    %c0_i32_1 = arith.constant 0 : i32
    return %c0_i32, %c0_i32_0 : i32, i32
  }
  func.func @transform_4(%arg0: i32) -> (i32, i32) {
    %c0_i32 = arith.constant 0 : i32
    %c0_i32_0 = arith.constant 0 : i32
    %c0_i32_1 = arith.constant 0 : i32
    return %c0_i32, %c0_i32_0 : i32, i32
  }
  func.func @transform_5(%arg0: i32) -> (i32, i32) {
    %c0_i32 = arith.constant 0 : i32
    %c0_i32_0 = arith.constant 0 : i32
    return %c0_i32, %arg0 : i32, i32
  }
}

</mosaic_0001>

<bundles_post_ra>
// kernel: tpu_custom_call.1
= control target key start
LH: loop header
LB: loop body
LE: loop exit
PB: predicated region body
PF: predicated region fallthrough
CT: control target
= control target key end

     0   :  { %10 = vsyncpa [#allocation5], 0  ;;  %s4001_s0 = inlined_call_operand.hbm [shape: f32[9,1280], index: 0, kind: input, shape index: {}]   ;;  %s4002_s1 = inlined_call_operand.vmem [shape: bf16[4,16,33], index: 1, kind: input, shape index: {}]   ;;  %s4003_s2 = inlined_call_operand.vmem [shape: bf16[4,16,9], index: 2, kind: input, shape index: {}]   ;;  %s4004_s3 = inlined_call_operand.vmem [shape: bf16[8,8], index: 3, kind: input, shape index: {}]   ;;  %s4005_s4 = inlined_call_operand.vmem [shape: f32[8,5], index: 4, kind: input, shape index: {}]   ;;  %s4006_s5 = inlined_call_operand.hbm [shape: f32[1,1024], index: 5, kind: output, shape index: {}]  }
   0x1   :  { %11 = vsyncpa [#allocation6], 0 }
   0x2   :  { %13 = vsyncpa [#allocation6 + $0x1], 0  ;;  %s3118_s18 = smov 0   ;;  %s3120_s19 = smov 0  }
   0x3   :  { %s3122_s20 = smov 0   ;;  %s3124_s21 = smov 0  }
   0x4 LB: > { %s3139_s22 = sadd.s32 4294967295, %s3065_s21   ;;  %s2649_s23 = sadd.s32 4294967294, %s3065_s21   ;;  %s3065_s21 = sphi %s3124_s21, %s4053_s21   ;;  %s3061_s20 = sphi %s3122_s20, %s4052_s20   ;;  %s3057_s19 = sphi %s3120_s19, %s4051_s19   ;;  %s3053_s18 = sphi %s3118_s18, %s4050_s18  }
   0x5   : > { %s3143_s24 = sadd.s32 1, %s3065_s21   ;;  %s131_s25 = sadd.s32 1, %s3061_s20 }
   0x6   : > { %s128_s26 = ssub.s32 %s3065_s21, %s3143_s24  ;;  %p141_p0 = scmp.ne.s32.totalorder %s3061_s20, %s3057_s19 }
   0x7   : > { %p129_p1 = scmp.eq.s32.totalorder %s128_s26, 0  ;;  %p142_p2 = scmp.eq.s32.totalorder %s3139_s22, 1 }
   0x8   : > { %p147_p3 = scmp.ne.s32.totalorder %s3057_s19, %s3053_s18  ;;  %p148_p4 = scmp.eq.s32.totalorder %s2649_s23, 1 }
   0x9   : > { %s3154_s27 = scalar_select %p129_p1, %s3061_s20, %s131_s25  }
   0xa   : > { %p3156_p5 = por %p142_p2, %p141_p0  ;;  %p3160_p6 = por %p148_p4, %p147_p3 }
   0xb   : > { %p2650_p7 = scmp.ge.s32.totalorder %s3065_s21, 1  ;;  %p155_p8 = scmp.lt.s32.totalorder %s3065_s21, 3 }
   0xc   : > { %s4011_s28 = scalar_select %p3156_p5, 1, 0 }
   0xd   : > { %s4012_s29 = scalar_select %p3160_p6, 1, 0 }
   0xe   : > { %p4007_p9 = scmp.eq.s32.totalorder %s3139_s22, 0  ;;  %p3167_p10 = pnand %p2650_p7, %p155_p8 }
   0xf   : > { %s3067_s6 = smov [#allocation4]   ;;  %s2971_s11 = scalar_lea.hbm %s4001_s0, 2560 }
  0x10   : > { %s4013_s30 = scalar_select %p3167_p10, 1, 0 }
  0x11   : > { %s167_s7 = sshll.u32 %s3067_s6, 4  ;;  %p2726_p11 = pneg %p3167_p10  ;;  %s168_s7 = int_to_ptr.vmem [resolvable:$true] %s167_s7 }
  0x12   : > { %p2972_p13 = scmp.ne.s32.totalorder %s4001_s0, %s2971_s11  ;;  %p2978_p3 = scmp.lt.u32.totalorder %s2971_s11, %s4001_s0 }
  0x13   : > { %p3175_p12 = pnand %p4007_p9, %p2726_p11 }
  0x15   : > { %p2973_p0 = pneg %p3175_p12 }
  0x17   : > { %p2974_p1 = pnand %p2973_p0, %p2972_p13 }
  0x19   : > { %p2975_p2 = pneg %p2974_p1 }
  0x1b   : > { %p2980_p4 = pnand %p2978_p3, %p2975_p2 }
  0x1d   : > { %2983 = shalt.err (!%p2980_p4)
}
  0x1e   : > { %s2984_s16 = scalar_lea.vmem %s168_s7, 2560  ;;  %p2992_p9 = scmp.lt.s32.totalorder %s168_s7, %s168_s7 }
  0x1f   : > { %p2985_p7 = scmp.ne.s32.totalorder %s168_s7, %s2984_s16  ;;  %p2993_p6 = scmp.lt.s32.totalorder %s2984_s16, %s2984_s16 }
  0x21   : > { %p2987_p8 = pnand %p2985_p7, %p2973_p0  ;;  %p2994_p5 = por %p2993_p6, %p2992_p9 }
  0x23   : > { %p2988_p11 = pneg %p2987_p8 }
  0x25   : > { %p2995_p10 = pnand %p2994_p5, %p2988_p11 }
  0x27   : > { %2998 = shalt.err (!%p2995_p10)
}
  0x28   : > { %s3068_s17 = smov 1280   ;;  %s3069_s23 = smov 80  }
  0x29   : > { %2729 = dma.hbm_to_vmem [thread:$0]  (!%p3175_p12), %s4001_s0, 2560, %s168_s7, [#allocation5], %s3068_s17, %s3068_s17, %s3069_s23  }
  0x2a   : > { %p4015_p13 = scmp.ne.s32.totalorder %s4013_s30, 0 }
  0x2b   : > { %p4016_p1 = scmp.eq.s32.totalorder (!%p4015_p13), %s3139_s22, 0 }
  0x2c   : > { %195 = sbr.rel (%p4015_p13) target bundleno = 2881 (0xb41), region = 40 }
  0x33   : > { %3044 = dma.done.wait (%p4016_p1), [#allocation5], 2560   ;;  %p4017_p0 = pmov %p4016_p1 }
  0x34   : > { %v3070_v0 = vmov 0   ;;  %v237_v1 = vld [vmem:[%s4005_s4] sm:$0xff]  ;;  %v3071_v2 = vmov 1   ;;  %v238_v3 = vlaneseq  ;;  %s2655_s30 = sshll.u32 %s3139_s22, 9  ;;  %v3072_v18 = vmov 1.0   ;;  %s3073_s12 = smov 127  }
  0x35   : > { %3046 = vsyncadd (%p4017_p0), [#allocation5], 4294964736  ;;  %2788 = vset.pattern.permute.xlu0 %v3070_v0  ;;  %506 = vmatprep.mubr.bf16.mxu0 %v3070_v0  ;;  %s221_s7 = sshra.s32 %s2655_s30, 7  ;;  %s2657_s9 = sadd.s32 4294967168, %s2655_s30 }
  0x36   : > { %549 = vmatprep.mubr.bf16.mxu1 %v3070_v0  ;;  %289 = vperm.xlu0 %2788, %v237_v1   ;;  %v3209_v4 = vand.u32 127, %v238_v3  ;;  %s2656_s10 = sshll.u32 %s221_s7, 3  ;;  %v246_v6 = vstv %s2657_s9  ;;  %vm279_vm4 = vcmp.lt.s32.totalorder %v238_v3, 768  ;;  %s3074_s13 = smov 1  }
  0x37   : > { %s3215_s11 = scalar_lea.vmem [#allocation4], %s2656_s10  ;;  %282 = vst.msk [vmem:[#allocation2 + $0xc0] ss:$8 sm:$0xf] %vm279_vm4, %v3072_v18  ;;  %s3077_s23 = smov 2  }
  0x38   : > { %v240_v5 = vadd.s32 128, %v3209_v4  ;;  %v247_v8 = vadd.s32 %v246_v6, %v3209_v4  ;;  %v2659_v10 = vld [vmem:[%s3215_s11 + $0x58] ss:$0 sm:$0xff]  ;;  %v2658_v11 = vld [vmem:[%s3215_s11 + $0x50] ss:$0 sm:$0xff]  ;;  %v242_v12 = vadd.s32 384, %v3209_v4 }
  0x39   : > { %v3221_v13 = vld [vmem:[%s3215_s11] sm:$0xff]  ;;  %v244_v14 = vadd.s32 640, %v3209_v4  ;;  %283 = vst.msk [vmem:[#allocation2 + $0xc0] ss:$8 sm:$0x30] %vm279_vm4, %v3072_v18  ;;  %v241_v22 = vadd.s32 256, %v3209_v4 }
  0x3a   : > { %2789 = vset.pattern.permute.xlu0 %v3071_v2  ;;  %v248_v7 = vadd.s32 %v246_v6, %v240_v5  ;;  %vm253_vm2 = vcmp.ge.s32.totalorder %v247_v8, 0  ;;  %vm259_vm3 = vcmp.lt.s32.totalorder %v247_v8, 1024  ;;  %271 = vst [vmem:[#allocation2 + $0x90] sm:$0xff] %v3221_v13  ;;  %285 = vst.msk [vmem:[#allocation3 + $0x30] ss:$8 sm:$0xf] %vm279_vm4, %v3072_v18  ;;  %v250_v21 = vadd.s32 %v246_v6, %v242_v12 }
  0x3b   : > { %323 = vperm.xlu0 %2789, %v237_v1   ;;  %286 = vst.msk [vmem:[#allocation3 + $0x30] ss:$8 sm:$0x30] %vm279_vm4, %v3072_v18  ;;  %vm3232_vm6 = vmand %vm253_vm2, %vm259_vm3  ;;  %v252_v25 = vadd.s32 %v246_v6, %v244_v14  ;;  %v2661_v26 = vld [vmem:[%s3215_s11 + $0x68] ss:$0 sm:$0xff]  ;;  %v249_v30 = vadd.s32 %v246_v6, %v241_v22  ;;  %v243_v31 = vadd.s32 512, %v3209_v4 }
  0x3c   : > { %vm254_vm0 = vcmp.ge.s32.totalorder %v248_v7, 0  ;;  %vm260_vm1 = vcmp.lt.s32.totalorder %v248_v7, 1024  ;;  %v2663_v27 = vld [vmem:[%s3215_s11 + $0x78] ss:$0 sm:$0xff]  ;;  %vm256_vm7 = vcmp.ge.s32.totalorder %v250_v21, 0  ;;  %vm262_vm8 = vcmp.lt.s32.totalorder %v250_v21, 1024 }
  0x3d   : > { %vm3226_vm5 = vmand %vm254_vm0, %vm260_vm1  ;;  %v3259_v32 = vld [vmem:[%s3215_s11 + $0x8] sm:$0xff]  ;;  %vm258_vm9 = vcmp.ge.s32.totalorder %v252_v25, 0  ;;  %vm264_vm10 = vcmp.lt.s32.totalorder %v252_v25, 1024  ;;  %v2660_v36 = vld [vmem:[%s3215_s11 + $0x60] ss:$0 sm:$0xff]  ;;  %vm255_vm13 = vcmp.ge.s32.totalorder %v249_v30, 0  ;;  %v251_v43 = vadd.s32 %v246_v6, %v243_v31 }
  0x3e   : > { %v3262_v33 = vld [vmem:[%s3215_s11 + $0x28] sm:$0xff]  ;;  %272 = vst [vmem:[#allocation2 + $0x98] sm:$0xff] %v3259_v32  ;;  %vm3269_vm11 = vmand %vm256_vm7, %vm262_vm8  ;;  %v3286_v41 = vld [vmem:[%s3215_s11 + $0x10] sm:$0xff]  ;;  %vm261_vm14 = vcmp.lt.s32.totalorder %v249_v30, 1024  ;;  %vm350_vm3 = vcmp.lt.s32.totalorder %v3209_v4, 1  ;;  %vm3075_vm4 = vmmov 1  }
  0x3f   : > { %276 = vst [vmem:[#allocation2 + $0xb8] sm:$0xff] %v3262_v33  ;;  %vm3281_vm12 = vmand %vm258_vm9, %vm264_vm10  ;;  %v2662_v44 = vld [vmem:[%s3215_s11 + $0x70] ss:$0 sm:$0xff]  ;;  %vm257_vm0 = vcmp.ge.s32.totalorder %v251_v43, 0  ;;  %vm263_vm1 = vcmp.lt.s32.totalorder %v251_v43, 1024  ;;  %v3328_v53 = vld [vmem:[%s3215_s11 + $0x18] sm:$0xff] }
  0x40   : > { %273 = vst [vmem:[#allocation2 + $0xa0] sm:$0xff] %v3286_v41  ;;  %vm3307_vm15 = vmand %vm255_vm13, %vm261_vm14  ;;  %v3331_v54 = vld [vmem:[%s3215_s11 + $0x20] sm:$0xff]  ;;  %v421_v61 = vld [vmem:[#allocation2 + $0xc8] sm:$0x1]  ;;  %vm453_vm8 = vcmask 1040384   ;;  %vm381_vm9 = vcmp.lt.s32.totalorder %v3209_v4, 127 }
  0x41   : > { %vm3323_vm2 = vmand %vm257_vm0, %vm263_vm1  ;;  %274 = vst [vmem:[#allocation2 + $0xa8] sm:$0xff] %v3328_v53  ;;  %v439_v6 = vpack.c.bf16 %v421_v61, %v421_v61  ;;  %v420_v7 = vld [vmem:[#allocation2 + $0xc0] sm:$0x1]  ;;  %v3365_v8 = vsel %vm453_vm8, 65535, %v3070_v0  ;;  %v423_v25 = vld [vmem:[#allocation2 + $0xd8] sm:$0x1] }
  0x42   : > { %275 = vst [vmem:[#allocation2 + $0xb0] sm:$0xff] %v3331_v54  ;;  %vm3354_vm7 = vmpackc.low %vm3226_vm5, %vm3075_vm4  ;;  %v2794_v31 = vld [vmem:[%s4002_s1] sm:$0xff]   ;;  %vm449_vm13 = vcmask 269312   ;;  %vm675_vm8 = vcmask 1044480   ;;  %s3078_s25 = smov 126   ;;  %s3079_s7 = smov 4  }
  0x43   : > { %vm3372_vm10 = vmpackc.low %vm3232_vm6, %vm3075_vm4  ;;  %v460_v18 = vand.u32 %v3365_v8, %v439_v6  ;;  %s3080_s9 = smov 124   ;;  %s3081_s14 = smov 8  }
  0x44   : > { %vm3401_vm14 = vmpackc.low %vm3281_vm12, %vm3075_vm4  ;;  %s3082_s15 = smov 120   ;;  %s2719_s10 = sshll.u32 %s3139_s22, 6 }
  0x45   : > { %vm3414_vm0 = vmpackc.low %vm3269_vm11, %vm3075_vm4  ;;  %p4048_p6 = scmp.ne.s32.totalorder %s4011_s28, 0  ;;  %s3087_s22 = smov [#allocation7]  }
  0x46   : > { %vm3429_vm1 = vmpackc.low %vm3307_vm15, %vm3075_vm4 }
  0xb5   : > { %v3213_v9 = vpop.permute.xlu0 %289 }
  0xb6   : > { %v317_v16 = vmul.f32 %v2659_v10, %v3213_v9  ;;  %v316_v17 = vmul.f32 %v2658_v11, %v3213_v9  ;;  %v319_v34 = vmul.f32 %v2661_v26, %v3213_v9  ;;  %v321_v35 = vmul.f32 %v2663_v27, %v3213_v9  ;;  %v425_v26 = vld [vmem:[#allocation2 + $0xe8] sm:$0x1] }
  0xb7   : > { %v318_v42 = vmul.f32 %v2660_v36, %v3213_v9  ;;  %v320_v49 = vmul.f32 %v2662_v44, %v3213_v9  ;;  %v441_v44 = vpack.c.bf16 %v423_v25, %v423_v25 }
  0xba   : > { %v324_v19 = vpop.permute.xlu0 %323 }
  0xbb   : > { %v3237_v23 = vadd.f32 %v324_v19, %v317_v16  ;;  %v3239_v24 = vadd.f32 %v324_v19, %v316_v17  ;;  %v3273_v38 = vadd.f32 %v324_v19, %v319_v34  ;;  %v3275_v39 = vadd.f32 %v324_v19, %v321_v35  ;;  %v422_v34 = vld [vmem:[#allocation2 + $0xd0] sm:$0x1] }
  0xbc   : > { %v3301_v47 = vadd.f32 %v324_v19, %v318_v42  ;;  %v3317_v51 = vadd.f32 %v324_v19, %v320_v49  ;;  %v438_v16 = vpack.c.bf16 %v420_v7, %v420_v7  ;;  %v424_v49 = vld [vmem:[#allocation2 + $0xe0] sm:$0x1] }
  0xbd   : > { %v3246_v28 = vsel %vm3226_vm5, %v3237_v23, 0.0  ;;  %v3251_v29 = vsel %vm3232_vm6, %v3239_v24, 0.0  ;;  %v3294_v45 = vsel %vm3269_vm11, %v3273_v38, 0.0  ;;  %v3299_v46 = vsel %vm3281_vm12, %v3275_v39, 0.0 }
  0xbe   : > { %371 = vrot.lane.b32.xlu0 %v3246_v28, %s3073_s12  ;;  %338 = vrot.lane.b32.xlu1 %v3251_v29, %s3074_s13  ;;  %v3315_v50 = vsel %vm3307_vm15, %v3301_v47, 0.0  ;;  %v3338_v55 = vsel %vm3323_vm2, %v3317_v51, 0.0 }
  0xc2   : > { %369 = vrot.lane.b32.xlu0 %v3251_v29, %s3073_s12  ;;  %340 = vrot.lane.b32.xlu1 %v3246_v28, %s3074_s13 }
  0xc6   : > { %344 = vrot.lane.b32.xlu0 %v3294_v45, %s3074_s13  ;;  %348 = vrot.lane.b32.xlu1 %v3299_v46, %s3074_s13 }
  0xca   : > { %379 = vrot.lane.b32.xlu0 %v3299_v46, %s3073_s12  ;;  %373 = vrot.lane.b32.xlu1 %v3315_v50, %s3073_s12 }
  0xce   : > { %375 = vrot.lane.b32.xlu0 %v3294_v45, %s3073_s12  ;;  %346 = vrot.lane.b32.xlu1 %v3338_v55, %s3074_s13 }
  0xd2   : > { %342 = vrot.lane.b32.xlu1 %v3315_v50, %s3074_s13 }
  0xd6   : > { %377 = vrot.lane.b32.xlu1 %v3338_v55, %s3073_s12 }
 0x130   : > { %v372_v56 = vpop.permute.xlu0 %371  ;;  %v339_v57 = vpop.permute.xlu1 %338 }
 0x134   : > { %v370_v58 = vpop.permute.xlu0 %369  ;;  %v341_v59 = vpop.permute.xlu1 %340 }
 0x135   : > { %v355_v60 = vsel %vm350_vm3, %v339_v57, %v341_v59  ;;  %v386_v9 = vsel %vm381_vm9, %v370_v58, %v372_v56 }
 0x136   : > { %v2900_v1 = vpack.c.bf16 %v3237_v23, %v355_v60  ;;  %v432_v21 = vpack.c.bf16 %v3221_v13, %v386_v9  ;;  %v440_v60 = vpack.c.bf16 %v422_v34, %v422_v34 }
 0x138   : > { %v349_v62 = vpop.permute.xlu1 %348  ;;  %2901 = vmatprep.subr.msk.bf16.mxu0 %vm3354_vm7, %v2900_v1  ;;  %v345_v2 = vpop.permute.xlu0 %344 }
 0x139   : > { %v356_v5 = vsel %vm350_vm3, %v349_v62, %v339_v57 }
 0x13a   : > { %v2903_v12 = vpack.c.bf16 %v3239_v24, %v356_v5  ;;  %v457_v24 = vand.u32 %v3365_v8, %v438_v16 }
 0x13c   : > { %v374_v10 = vpop.permute.xlu1 %373  ;;  %2904 = vmatpush1.bf16.msk.msra.mxu0 %vm3372_vm10, %v2903_v12  ;;  %v380_v19 = vpop.permute.xlu0 %379  ;;  %v466_v12 = vand.u32 %v3365_v8, %v441_v44 }
 0x13d   : > { %v385_v14 = vsel %vm381_vm9, %v372_v56, %v374_v10  ;;  %v387_v35 = vsel %vm381_vm9, %v380_v19, %v370_v58  ;;  %v443_v58 = vpack.c.bf16 %v425_v26, %v425_v26 }
 0x13e   : > { %v433_v17 = vpack.c.bf16 %v3259_v32, %v385_v14  ;;  %v437_v1 = vpack.c.bf16 %v3262_v33, %v387_v35 }
 0x13f   : > { %v472_v16 = vand.u32 %v3365_v8, %v443_v58 }
 0x140   : > { %v347_v22 = vpop.permute.xlu1 %346  ;;  %476 = vmatprep.subr.bf16.mxu0 %v433_v17  ;;  %v376_v36 = vpop.permute.xlu0 %375 }
 0x141   : > { %v351_v23 = vsel %vm350_vm3, %v347_v22, %v349_v62  ;;  %477 = vmatpush1.bf16.msra.mxu0 %v432_v21  ;;  %v352_v27 = vsel %vm350_vm3, %v345_v2, %v347_v22 }
 0x142   : > { %478 = vmatprep.subr.bf16.mxu0 %v460_v18  ;;  %v2906_v57 = vpack.c.bf16 %v3275_v39, %v351_v23 }
 0x144   : > { %v343_v30 = vpop.permute.xlu1 %342 }
 0x145   : > { %v353_v42 = vsel %vm350_vm3, %v343_v30, %v345_v2  ;;  %v354_v43 = vsel %vm350_vm3, %v341_v59, %v343_v30  ;;  %479 = vmatpush1.bf16.msra.mxu0 %v457_v24  ;;  %v384_v59 = vsel %vm381_vm9, %v374_v10, %v376_v36  ;;  %v442_v2 = vpack.c.bf16 %v424_v49, %v424_v49  ;;  %vm3439_vm3 = vmpackc.low %vm3323_vm2, %vm3075_vm4 }
 0x146   : > { %2907 = vmatprep.subr.msk.bf16.mxu0 %vm3401_vm14, %v2906_v57  ;;  %v2909_v39 = vpack.c.bf16 %v3273_v38, %v353_v42  ;;  %v2912_v38 = vpack.c.bf16 %v3301_v47, %v354_v43  ;;  %v2915_v10 = vpack.c.bf16 %v3317_v51, %v352_v27  ;;  %v434_v17 = vpack.c.bf16 %v3286_v41, %v384_v59 }
 0x147   : > { %v463_v51 = vand.u32 %v3365_v8, %v440_v60  ;;  %v469_v18 = vand.u32 %v3365_v8, %v442_v2  ;;  %vm4010_vm4 = vcmask 1043456  }
 0x148   : > { %v378_v61 = vpop.permute.xlu1 %377  ;;  %2665 = vmatmul.mubr.msk.bf16.vlgmr.msra.gmra.mrb[0].mxu0 %vm449_vm13, %v2794_v31  ;;  %2910 = vmatprep.subr.msk.bf16.mxu1 %vm3414_vm0, %v2909_v39 }
 0x149   : > { %v382_v5 = vsel %vm381_vm9, %v378_v61, %v380_v19  ;;  %v383_v6 = vsel %vm381_vm9, %v376_v36, %v378_v61  ;;  %2913 = vmatpush1.bf16.msk.msra.mxu1 %vm3429_vm1, %v2912_v38  ;;  %2916 = vmatpush1.bf16.msk.msra.mxu0 %vm3439_vm3, %v2915_v10  ;;  %v653_v38 = vld [vmem:[#allocation3 + $0x30] sm:$0x1]  ;;  %vm670_vm9 = vcmask 72704  }
 0x14a   : > { %562 = vmatprep.subr.bf16.mxu0 %v437_v1  ;;  %v435_v47 = vpack.c.bf16 %v3328_v53, %v383_v6  ;;  %v436_v14 = vpack.c.bf16 %v3331_v54, %v382_v5  ;;  %592 = vmatprep.mubr.bf16.mxu0 %v3070_v0  ;;  %v3076_v5 = vmov 65535  }
 0x14b   : > { %v676_v6 = vsel %vm4010_vm4, 4294967295, %v3076_v5  ;;  %vm886_vm4 = vcmp.lt.s32.totalorder %v3209_v4, 126 }
 0x14c   : > { %519 = vmatprep.subr.bf16.mxu1 %v435_v47  ;;  %v654_v47 = vld [vmem:[#allocation3 + $0x38] sm:$0x1] }
 0x14d   : > { %520 = vmatpush1.bf16.msra.mxu1 %v434_v17  ;;  %563 = vmatpush1.bf16.msra.mxu0 %v436_v14 }
 0x14e   : > { %521 = vmatprep.subr.bf16.mxu1 %v466_v12  ;;  %564 = vmatprep.subr.bf16.mxu0 %v472_v16  ;;  %v3459_v16 = vsel %vm675_vm8, %v676_v6, 0  ;;  %vm855_vm8 = vcmp.lt.s32.totalorder %v3209_v4, 2 }
 0x151   : > { %522 = vmatpush1.bf16.msra.mxu1 %v463_v51  ;;  %565 = vmatpush1.bf16.msra.mxu0 %v469_v18 }
 0x154   : > { %2666 = vmatmul.mubr.msk.bf16.vlgmr.msra.gmra.mrb[0].mxu1 %vm449_vm13, %v2794_v31  ;;  %2667 = vmatmul.mubr.msk.bf16.vlgmr.msra.gmra.mrb[4].mxu0 %vm449_vm13, %v2794_v31 }
 0x155   : > { %728 = vmatprep.mubr.bf16.mxu1 %v3070_v0  ;;  %814 = vmatprep.mubr.bf16.mxu0 %v3070_v0 }
 0x21b   : > { %v508_v19 = vpop.f32.mrb[0].mxu0 }
 0x21c   : > { %v510_v21 = vpop.f32.mrb[1].mxu0 }
 0x21d   : > { %v512_v22 = vpop.f32.mrb[2].mxu0 }
 0x21e   : > { %v609_v23 = vmul.f32 0.5, %v512_v22  ;;  %v514_v24 = vpop.f32.mrb[3].mxu0  ;;  %v2795_v22 = vld [vmem:[%s4003_s2] sm:$0xff]  }
 0x21f   : > { %v610_v25 = vmul.f32 0.5, %v514_v24 }
 0x220   : > { %2802 = vtanh.f32 %v609_v23 }
 0x221   : > { %2804 = vtanh.f32 %v610_v25 }
 0x222   : > { %2806 = vtanh.f32 %v508_v19 }
 0x223   : > { %2808 = vtanh.f32 %v510_v21 }
 0x227   : > { %v551_v26 = vpop.f32.mrb[0].mxu1  ;;  %v594_v27 = vpop.f32.mrb[4].mxu0 }
 0x228   : > { %v553_v30 = vpop.f32.mrb[1].mxu1  ;;  %v596_v34 = vpop.f32.mrb[5].mxu0 }
 0x229   : > { %v555_v35 = vpop.f32.mrb[2].mxu1  ;;  %v598_v31 = vpop.f32.mrb[6].mxu0 }
 0x22a   : > { %v2803_v36 = vpop.eup %2802  ;;  %v611_v42 = vmul.f32 0.5, %v555_v35  ;;  %v613_v43 = vmul.f32 0.5, %v598_v31  ;;  %v557_v44 = vpop.f32.mrb[3].mxu1 }
 0x22b   : > { %v600_v49 = vpop.f32.mrb[7].mxu0  ;;  %v2805_v57 = vpop.eup %2804  ;;  %v621_v58 = vmul.f32 0.5, %v2803_v36  ;;  %v612_v60 = vmul.f32 0.5, %v557_v44 }
 0x22c   : > { %v614_v59 = vmul.f32 0.5, %v600_v49  ;;  %v622_v61 = vmul.f32 0.5, %v2805_v57  ;;  %2810 = vtanh.f32 %v611_v42  ;;  %v2807_v1 = vpop.eup %2806  ;;  %v655_v49 = vld [vmem:[#allocation3 + $0x40] sm:$0x1] }
 0x22d   : > { %v627_v39 = vadd.f32 0.5, %v621_v58  ;;  %2812 = vtanh.f32 %v613_v43  ;;  %v2809_v10 = vpop.eup %2808 }
 0x22e   : > { %v628_v2 = vadd.f32 0.5, %v622_v61  ;;  %2814 = vtanh.f32 %v612_v60  ;;  %v657_v61 = vld [vmem:[#allocation3 + $0x50] sm:$0x1] }
 0x22f   : > { %v633_v12 = vmul.f32 %v2807_v1, %v627_v39  ;;  %2816 = vtanh.f32 %v614_v59  ;;  %v656_v59 = vld [vmem:[#allocation3 + $0x48] sm:$0x1] }
 0x230   : > { %v634_v14 = vmul.f32 %v2809_v10, %v628_v2  ;;  %2818 = vtanh.f32 %v551_v26  ;;  %v658_v2 = vld [vmem:[#allocation3 + $0x58] sm:$0x1] }
 0x231   : > { %2820 = vtanh.f32 %v594_v27  ;;  %v659_v17 = vpack.c.bf16 %v653_v38, %v633_v12 }
 0x232   : > { %2822 = vtanh.f32 %v553_v30  ;;  %v660_v51 = vpack.c.bf16 %v654_v47, %v634_v14 }
 0x233   : > { %2824 = vtanh.f32 %v596_v34  ;;  %v679_v19 = vand.u32 %v3459_v16, %v659_v17 }
 0x234   : > { %v682_v18 = vand.u32 %v3459_v16, %v660_v51 }
 0x236   : > { %v2811_v21 = vpop.eup %2810  ;;  %696 = vmatprep.subr.bf16.mxu1 %v682_v18 }
 0x237   : > { %v2813_v23 = vpop.eup %2812  ;;  %v623_v24 = vmul.f32 0.5, %v2811_v21  ;;  %697 = vmatpush1.bf16.msra.mxu1 %v679_v19 }
 0x238   : > { %v2815_v25 = vpop.eup %2814  ;;  %v625_v26 = vmul.f32 0.5, %v2813_v23 }
 0x239   : > { %v2817_v27 = vpop.eup %2816  ;;  %v629_v30 = vadd.f32 0.5, %v623_v24  ;;  %v624_v35 = vmul.f32 0.5, %v2815_v25 }
 0x23a   : > { %v2819_v34 = vpop.eup %2818  ;;  %v631_v31 = vadd.f32 0.5, %v625_v26  ;;  %v626_v36 = vmul.f32 0.5, %v2817_v27  ;;  %2669 = vmatmul.mubr.msk.bf16.vlgmr.msra.gmra.mrb[4].mxu1 %vm670_vm9, %v2795_v22 }
 0x23b   : > { %v2821_v42 = vpop.eup %2820  ;;  %v635_v43 = vmul.f32 %v2819_v34, %v629_v30  ;;  %v630_v44 = vadd.f32 0.5, %v624_v35  ;;  %771 = vmatprep.mubr.bf16.mxu1 %v3070_v0 }
 0x23c   : > { %v2823_v57 = vpop.eup %2822  ;;  %v637_v58 = vmul.f32 %v2821_v42, %v631_v31  ;;  %v632_v60 = vadd.f32 0.5, %v626_v36 }
 0x23d   : > { %v2825_v39 = vpop.eup %2824  ;;  %v636_v1 = vmul.f32 %v2823_v57, %v630_v44  ;;  %v661_v6 = vpack.c.bf16 %v655_v49, %v635_v43 }
 0x23e   : > { %v638_v5 = vmul.f32 %v2825_v39, %v632_v60  ;;  %v663_v10 = vpack.c.bf16 %v657_v61, %v637_v58 }
 0x23f   : > { %v662_v38 = vpack.c.bf16 %v656_v59, %v636_v1  ;;  %v685_v17 = vand.u32 %v3459_v16, %v661_v6 }
 0x240   : > { %v664_v12 = vpack.c.bf16 %v658_v2, %v638_v5  ;;  %v691_v51 = vand.u32 %v3459_v16, %v663_v10 }
 0x241   : > { %v688_v47 = vand.u32 %v3459_v16, %v662_v38 }
 0x242   : > { %v694_v14 = vand.u32 %v3459_v16, %v664_v12  ;;  %v927_v12 = vld [vmem:[#allocation2 + $0xc8] sm:$0x1] }
 0x243   : > { %739 = vmatprep.subr.bf16.mxu1 %v688_v47 }
 0x244   : > { %782 = vmatprep.subr.bf16.mxu0 %v694_v14  ;;  %740 = vmatpush1.bf16.msra.mxu1 %v685_v17 }
 0x245   : > { %783 = vmatpush1.bf16.msra.mxu0 %v691_v51  ;;  %v945_v51 = vpack.c.bf16 %v927_v12, %v927_v12 }
 0x247   : > { %2670 = vmatmul.mubr.msk.bf16.vlgmr.msra.gmra.mrb[8].mxu1 %vm670_vm9, %v2795_v22 }
 0x248   : > { %2671 = vmatmul.mubr.msk.bf16.vlgmr.msra.gmra.mrb[8].mxu0 %vm670_vm9, %v2795_v22  ;;  %1008 = vmatprep.mubr.bf16.mxu1 %v3070_v0 }
 0x249   : > { %1051 = vmatprep.mubr.bf16.mxu0 %v3070_v0 }
 0x30d   : > { %v3476_v18 = vpop.f32.mrb[4].mxu1 }
 0x30e   : > { %v3478_v19 = vpop.f32.mrb[5].mxu1 }
 0x30f   : > { %v734_v21 = vpop.f32.mrb[6].mxu1 }
 0x310   : > { %v825_v23 = vadd.f32 %v734_v21, %v3251_v29  ;;  %v736_v24 = vpop.f32.mrb[7].mxu1  ;;  %v926_v21 = vld [vmem:[#allocation2 + $0xc0] sm:$0x1] }
 0x311   : > { %v826_v25 = vadd.f32 %v736_v24, %v3246_v28 }
 0x312   : > { %v831_v26 = vmul.f32 0.70710677, %v825_v23 }
 0x313   : > { %v832_v27 = vmul.f32 0.70710677, %v826_v25 }
 0x314   : > { %v3484_v30 = vsel %vm3232_vm6, %v831_v26, 0.0 }
 0x315   : > { %v3488_v22 = vsel %vm3226_vm5, %v832_v27, 0.0  ;;  %843 = vrot.lane.b32.xlu1 %v3484_v30, %s3077_s23 }
 0x316   : > { %845 = vrot.lane.b32.xlu0 %v3488_v22, %s3077_s23 }
 0x31a   : > { %v3494_v29 = vpop.f32.mrb[8].mxu1  ;;  %876 = vrot.lane.b32.xlu0 %v3488_v22, %s3078_s25 }
 0x31b   : > { %v3497_v28 = vpop.f32.mrb[8].mxu0  ;;  %v3499_v35 = vpop.f32.mrb[9].mxu1 }
 0x31c   : > { %v3501_v34 = vpop.f32.mrb[9].mxu0  ;;  %v777_v31 = vpop.f32.mrb[10].mxu1 }
 0x31d   : > { %v820_v36 = vpop.f32.mrb[10].mxu0  ;;  %v779_v42 = vpop.f32.mrb[11].mxu1  ;;  %v827_v49 = vadd.f32 %v777_v31, %v3315_v50  ;;  %v944_v31 = vpack.c.bf16 %v926_v21, %v926_v21  ;;  %v930_v21 = vld [vmem:[#allocation2 + $0xe0] sm:$0x1] }
 0x31e   : > { %v828_v43 = vadd.f32 %v779_v42, %v3294_v45  ;;  %v822_v44 = vpop.f32.mrb[11].mxu0  ;;  %874 = vrot.lane.b32.xlu0 %v3484_v30, %s3078_s25  ;;  %v829_v39 = vadd.f32 %v820_v36, %v3338_v55  ;;  %v962_v42 = vand.u32 %v945_v51, %v3365_v8 }
 0x31f   : > { %v830_v57 = vadd.f32 %v822_v44, %v3299_v46  ;;  %v3514_v61 = vmul.f32 0.70710677, %v827_v49 }
 0x320   : > { %v3507_v58 = vmul.f32 0.70710677, %v828_v43  ;;  %v3530_v50 = vmul.f32 0.70710677, %v829_v39  ;;  %v929_v39 = vld [vmem:[#allocation2 + $0xd8] sm:$0x1] }
 0x321   : > { %v836_v60 = vmul.f32 0.70710677, %v830_v57  ;;  %v3528_v46 = vsel %vm3307_vm15, %v3514_v61, 0.0  ;;  %v947_v51 = vpack.c.bf16 %v929_v39, %v929_v39 }
 0x322   : > { %v3512_v59 = vsel %vm3269_vm11, %v3507_v58, 0.0  ;;  %v3537_v55 = vsel %vm3323_vm2, %v3530_v50, 0.0 }
 0x323   : > { %v3519_v45 = vsel %vm3281_vm12, %v836_v60, 0.0  ;;  %849 = vrot.lane.b32.xlu0 %v3512_v59, %s3077_s23 }
 0x324   : > { %853 = vrot.lane.b32.xlu1 %v3519_v45, %s3077_s23 }
 0x327   : > { %884 = vrot.lane.b32.xlu0 %v3519_v45, %s3078_s25 }
 0x328   : > { %878 = vrot.lane.b32.xlu1 %v3528_v46, %s3078_s25 }
 0x32b   : > { %880 = vrot.lane.b32.xlu0 %v3512_v59, %s3078_s25 }
 0x32c   : > { %851 = vrot.lane.b32.xlu1 %v3537_v55, %s3077_s23 }
 0x330   : > { %847 = vrot.lane.b32.xlu1 %v3528_v46, %s3077_s23  ;;  %s3003_s23 = sshll.u32 %s3087_s22, 4  ;;  %s3004_s23 = int_to_ptr.vmem [resolvable:$false] %s3003_s23 }
 0x334   : > { %882 = vrot.lane.b32.xlu1 %v3537_v55, %s3078_s25  ;;  %s3005_s25 = scalar_lea.vmem %s3004_s23, 128 }
 0x387   : > { %v844_v1 = vpop.permute.xlu1 %843 }
 0x388   : > { %v846_v2 = vpop.permute.xlu0 %845 }
 0x389   : > { %v860_v5 = vsel %vm855_vm8, %v844_v1, %v846_v2 }
 0x38a   : > { %v2918_v38 = vpack.c.bf16 %v832_v27, %v860_v5 }
 0x38c   : > { %v877_v6 = vpop.permute.xlu0 %876  ;;  %2919 = vmatprep.subr.msk.bf16.mxu1 %vm3354_vm7, %v2918_v38 }
 0x390   : > { %v875_v10 = vpop.permute.xlu0 %874 }
 0x391   : > { %v891_v23 = vsel %vm886_vm4, %v875_v10, %v877_v6 }
 0x392   : > { %v938_v44 = vpack.c.bf16 %v3221_v13, %v891_v23  ;;  %v928_v13 = vld [vmem:[#allocation2 + $0xd0] sm:$0x1] }
 0x395   : > { %v850_v14 = vpop.permute.xlu0 %849 }
 0x396   : > { %v854_v47 = vpop.permute.xlu1 %853 }
 0x397   : > { %v861_v17 = vsel %vm855_vm8, %v854_v47, %v844_v1  ;;  %v931_v1 = vld [vmem:[#allocation2 + $0xe8] sm:$0x1] }
 0x398   : > { %v2921_v25 = vpack.c.bf16 %v831_v26, %v861_v17  ;;  %v959_v26 = vand.u32 %v944_v31, %v3365_v8 }
 0x399   : > { %v885_v43 = vpop.permute.xlu0 %884 }
 0x39a   : > { %v879_v24 = vpop.permute.xlu1 %878  ;;  %2922 = vmatpush1.bf16.msk.msra.mxu1 %vm3372_vm10, %v2921_v25  ;;  %v892_v38 = vsel %vm886_vm4, %v885_v43, %v875_v10  ;;  %v949_v25 = vpack.c.bf16 %v931_v1, %v931_v1 }
 0x39b   : > { %v890_v27 = vsel %vm886_vm4, %v877_v6, %v879_v24  ;;  %v2796_v6 = vld [vmem:[%s4002_s1 + $0x8] sm:$0xff]  }
 0x39c   : > { %v939_v36 = vpack.c.bf16 %v3259_v32, %v890_v27  ;;  %v946_v27 = vpack.c.bf16 %v928_v13, %v928_v13 }
 0x39d   : > { %v881_v12 = vpop.permute.xlu0 %880 }
 0x39e   : > { %v852_v49 = vpop.permute.xlu1 %851  ;;  %978 = vmatprep.subr.bf16.mxu1 %v939_v36  ;;  %v889_v31 = vsel %vm886_vm4, %v879_v24, %v881_v12  ;;  %v948_v36 = vpack.c.bf16 %v930_v21, %v930_v21 }
 0x39f   : > { %v856_v57 = vsel %vm855_vm8, %v852_v49, %v854_v47  ;;  %979 = vmatpush1.bf16.msra.mxu1 %v938_v44  ;;  %v857_v5 = vsel %vm855_vm8, %v850_v14, %v852_v49  ;;  %v974_v49 = vand.u32 %v949_v25, %v3365_v8 }
 0x3a0   : > { %980 = vmatprep.subr.bf16.mxu1 %v962_v42  ;;  %v2924_v23 = vpack.c.bf16 %v836_v60, %v856_v57  ;;  %v2933_v24 = vpack.c.bf16 %v3530_v50, %v857_v5  ;;  %v965_v50 = vand.u32 %v946_v27, %v3365_v8  ;;  %v971_v57 = vand.u32 %v948_v36, %v3365_v8 }
 0x3a2   : > { %v848_v32 = vpop.permute.xlu1 %847 }
 0x3a3   : > { %v858_v47 = vsel %vm855_vm8, %v848_v32, %v850_v14  ;;  %v859_v17 = vsel %vm855_vm8, %v846_v2, %v848_v32  ;;  %981 = vmatpush1.bf16.msra.mxu1 %v959_v26  ;;  %v943_v2 = vpack.c.bf16 %v3262_v33, %v892_v38  ;;  %vm1390_vm8 = vcmp.lt.s32.totalorder %v3209_v4, 124 }
 0x3a4   : > { %2925 = vmatprep.subr.msk.bf16.mxu1 %vm3401_vm14, %v2924_v23  ;;  %v2927_v14 = vpack.c.bf16 %v3507_v58, %v858_v47  ;;  %v2930_v44 = vpack.c.bf16 %v3514_v61, %v859_v17  ;;  %v968_v58 = vand.u32 %v947_v51, %v3365_v8  ;;  %v940_v61 = vpack.c.bf16 %v3286_v41, %v889_v31 }
 0x3a6   : > { %v883_v10 = vpop.permute.xlu1 %882  ;;  %2675 = vmatmul.mubr.msk.bf16.vlgmr.msra.gmra.mrb[12].mxu1 %vm449_vm13, %v2796_v6  ;;  %2928 = vmatprep.subr.msk.bf16.mxu0 %vm3414_vm0, %v2927_v14 }
 0x3a7   : > { %v887_v60 = vsel %vm886_vm4, %v883_v10, %v885_v43  ;;  %v888_v42 = vsel %vm886_vm4, %v881_v12, %v883_v10  ;;  %2931 = vmatpush1.bf16.msk.msra.mxu0 %vm3429_vm1, %v2930_v44  ;;  %2934 = vmatpush1.bf16.msk.msra.mxu1 %vm3439_vm3, %v2933_v24  ;;  %vm1359_vm4 = vcmp.lt.s32.totalorder %v3209_v4, 4 }
 0x3a8   : > { %1064 = vmatprep.subr.bf16.mxu1 %v943_v2  ;;  %v941_v33 = vpack.c.bf16 %v3328_v53, %v888_v42  ;;  %v942_v43 = vpack.c.bf16 %v3331_v54, %v887_v60  ;;  %1094 = vmatprep.mubr.bf16.mxu1 %v3070_v0  ;;  %v1156_v42 = vld [vmem:[#allocation3 + $0x30] sm:$0x1] }
 0x3aa   : > { %1021 = vmatprep.subr.bf16.mxu0 %v941_v33 }
 0x3ab   : > { %1022 = vmatpush1.bf16.msra.mxu0 %v940_v61  ;;  %1065 = vmatpush1.bf16.msra.mxu1 %v942_v43 }
 0x3ac   : > { %1023 = vmatprep.subr.bf16.mxu0 %v968_v58  ;;  %1066 = vmatprep.subr.bf16.mxu1 %v974_v49  ;;  %v1157_v58 = vld [vmem:[#allocation3 + $0x38] sm:$0x1] }
 0x3af   : > { %1024 = vmatpush1.bf16.msra.mxu0 %v965_v50  ;;  %1067 = vmatpush1.bf16.msra.mxu1 %v971_v57 }
 0x3b2   : > { %2676 = vmatmul.mubr.msk.bf16.vlgmr.msra.gmra.mrb[12].mxu0 %vm449_vm13, %v2796_v6  ;;  %2677 = vmatmul.mubr.msk.bf16.vlgmr.msra.gmra.mrb[16].mxu1 %vm449_vm13, %v2796_v6 }
 0x3b3   : > { %1226 = vmatprep.mubr.bf16.mxu0 %v3070_v0  ;;  %1312 = vmatprep.mubr.bf16.mxu1 %v3070_v0 }
 0x479   : > { %v1010_v41 = vpop.f32.mrb[12].mxu1 }
 0x47a   : > { %v1012_v53 = vpop.f32.mrb[13].mxu1 }
 0x47b   : > { %v1014_v54 = vpop.f32.mrb[14].mxu1 }
 0x47c   : > { %v1111_v26 = vmul.f32 0.5, %v1014_v54  ;;  %v1016_v39 = vpop.f32.mrb[15].mxu1 }
 0x47d   : > { %v1112_v1 = vmul.f32 0.5, %v1016_v39 }
 0x47e   : > { %2826 = vtanh.f32 %v1111_v26 }
 0x47f   : > { %2828 = vtanh.f32 %v1112_v1 }
 0x480   : > { %2830 = vtanh.f32 %v1010_v41  ;;  %v2797_v41 = vld [vmem:[%s4003_s2 + $0x8] sm:$0xff]  }
 0x481   : > { %2832 = vtanh.f32 %v1012_v53 }
 0x485   : > { %v1053_v5 = vpop.f32.mrb[12].mxu0  ;;  %v1096_v32 = vpop.f32.mrb[16].mxu1 }
 0x486   : > { %v1055_v13 = vpop.f32.mrb[13].mxu0  ;;  %v1098_v38 = vpop.f32.mrb[17].mxu1 }
 0x487   : > { %v1057_v12 = vpop.f32.mrb[14].mxu0  ;;  %v1100_v6 = vpop.f32.mrb[18].mxu1 }
 0x488   : > { %v2827_v47 = vpop.eup %2826  ;;  %v1113_v17 = vmul.f32 0.5, %v1057_v12  ;;  %v1115_v51 = vmul.f32 0.5, %v1100_v6  ;;  %v1059_v21 = vpop.f32.mrb[15].mxu0 }
 0x489   : > { %v1102_v23 = vpop.f32.mrb[19].mxu1  ;;  %v2829_v25 = vpop.eup %2828  ;;  %v1123_v27 = vmul.f32 0.5, %v2827_v47  ;;  %v1114_v31 = vmul.f32 0.5, %v1059_v21 }
 0x48a   : > { %v1116_v10 = vmul.f32 0.5, %v1102_v23  ;;  %v1124_v14 = vmul.f32 0.5, %v2829_v25  ;;  %2834 = vtanh.f32 %v1113_v17  ;;  %v2831_v36 = vpop.eup %2830 }
 0x48b   : > { %v1129_v2 = vadd.f32 0.5, %v1123_v27  ;;  %2836 = vtanh.f32 %v1115_v51  ;;  %v2833_v44 = vpop.eup %2832  ;;  %v1158_v51 = vld [vmem:[#allocation3 + $0x40] sm:$0x1]  ;;  %v1159_v27 = vld [vmem:[#allocation3 + $0x48] sm:$0x1] }
 0x48c   : > { %v1130_v60 = vadd.f32 0.5, %v1124_v14  ;;  %2838 = vtanh.f32 %v1114_v31  ;;  %v1160_v31 = vld [vmem:[#allocation3 + $0x50] sm:$0x1] }
 0x48d   : > { %v1135_v24 = vmul.f32 %v2831_v36, %v1129_v2  ;;  %2840 = vtanh.f32 %v1116_v10  ;;  %v1161_v2 = vld [vmem:[#allocation3 + $0x58] sm:$0x1] }
 0x48e   : > { %v1136_v33 = vmul.f32 %v2833_v44, %v1130_v60  ;;  %2842 = vtanh.f32 %v1053_v5 }
 0x48f   : > { %2844 = vtanh.f32 %v1096_v32  ;;  %v1162_v43 = vpack.c.bf16 %v1156_v42, %v1135_v24 }
 0x490   : > { %2846 = vtanh.f32 %v1055_v13  ;;  %v1163_v49 = vpack.c.bf16 %v1157_v58, %v1136_v33 }
 0x491   : > { %2848 = vtanh.f32 %v1098_v38  ;;  %v1177_v50 = vand.u32 %v1162_v43, %v3459_v16 }
 0x492   : > { %v1180_v61 = vand.u32 %v1163_v49, %v3459_v16 }
 0x494   : > { %v2835_v57 = vpop.eup %2834  ;;  %1194 = vmatprep.subr.bf16.mxu0 %v1180_v61 }
 0x495   : > { %v2837_v53 = vpop.eup %2836  ;;  %v1125_v54 = vmul.f32 0.5, %v2835_v57  ;;  %1195 = vmatpush1.bf16.msra.mxu0 %v1177_v50 }
 0x496   : > { %v2839_v26 = vpop.eup %2838  ;;  %v1127_v39 = vmul.f32 0.5, %v2837_v53 }
 0x497   : > { %v2841_v1 = vpop.eup %2840  ;;  %v1131_v5 = vadd.f32 0.5, %v1125_v54  ;;  %v1126_v32 = vmul.f32 0.5, %v2839_v26 }
 0x498   : > { %v2843_v13 = vpop.eup %2842  ;;  %v1133_v38 = vadd.f32 0.5, %v1127_v39  ;;  %v1128_v12 = vmul.f32 0.5, %v2841_v1  ;;  %2681 = vmatmul.mubr.msk.bf16.vlgmr.msra.gmra.mrb[16].mxu0 %vm670_vm9, %v2797_v41 }
 0x499   : > { %v2845_v6 = vpop.eup %2844  ;;  %v1137_v47 = vmul.f32 %v2843_v13, %v1131_v5  ;;  %v1132_v17 = vadd.f32 0.5, %v1126_v32  ;;  %1269 = vmatprep.mubr.bf16.mxu0 %v3070_v0 }
 0x49a   : > { %v2847_v21 = vpop.eup %2846  ;;  %v1139_v23 = vmul.f32 %v2845_v6, %v1133_v38  ;;  %v1134_v25 = vadd.f32 0.5, %v1128_v12 }
 0x49b   : > { %v2849_v10 = vpop.eup %2848  ;;  %v1138_v14 = vmul.f32 %v2847_v21, %v1132_v17  ;;  %v1164_v60 = vpack.c.bf16 %v1158_v51, %v1137_v47 }
 0x49c   : > { %v1140_v36 = vmul.f32 %v2849_v10, %v1134_v25  ;;  %v1166_v44 = vpack.c.bf16 %v1160_v31, %v1139_v23 }
 0x49d   : > { %v1165_v42 = vpack.c.bf16 %v1159_v27, %v1138_v14  ;;  %v1183_v43 = vand.u32 %v1164_v60, %v3459_v16 }
 0x49e   : > { %v1167_v24 = vpack.c.bf16 %v1161_v2, %v1140_v36  ;;  %v1189_v49 = vand.u32 %v1166_v44, %v3459_v16 }
 0x49f   : > { %v1186_v58 = vand.u32 %v1165_v42, %v3459_v16 }
 0x4a0   : > { %v1192_v33 = vand.u32 %v1167_v24, %v3459_v16  ;;  %v1431_v24 = vld [vmem:[#allocation2 + $0xc8] sm:$0x1] }
 0x4a1   : > { %1237 = vmatprep.subr.bf16.mxu0 %v1186_v58 }
 0x4a2   : > { %1280 = vmatprep.subr.bf16.mxu1 %v1192_v33  ;;  %1238 = vmatpush1.bf16.msra.mxu0 %v1183_v43 }
 0x4a3   : > { %1281 = vmatpush1.bf16.msra.mxu1 %v1189_v49  ;;  %v1449_v49 = vpack.c.bf16 %v1431_v24, %v1431_v24 }
 0x4a5   : > { %2682 = vmatmul.mubr.msk.bf16.vlgmr.msra.gmra.mrb[20].mxu0 %vm670_vm9, %v2797_v41 }
 0x4a6   : > { %2683 = vmatmul.mubr.msk.bf16.vlgmr.msra.gmra.mrb[20].mxu1 %vm670_vm9, %v2797_v41  ;;  %1512 = vmatprep.mubr.bf16.mxu0 %v3070_v0 }
 0x4a7   : > { %1555 = vmatprep.mubr.bf16.mxu1 %v3070_v0 }
 0x56b   : > { %v1228_v61 = vpop.f32.mrb[16].mxu0 }
 0x56c   : > { %v3623_v50 = vadd.f32 %v1228_v61, %v3476_v18  ;;  %v1230_v57 = vpop.f32.mrb[17].mxu0  ;;  %v1430_v61 = vld [vmem:[#allocation2 + $0xc0] sm:$0x1] }
 0x56d   : > { %v3626_v53 = vadd.f32 %v1230_v57, %v3478_v19  ;;  %v1232_v54 = vpop.f32.mrb[18].mxu0  ;;  %v3714_v57 = vld [vmem:[#allocation2 + $0x98] sm:$0xff] }
 0x56e   : > { %v1323_v26 = vadd.f32 %v1232_v54, %v3484_v30  ;;  %v1234_v39 = vpop.f32.mrb[19].mxu0 }
 0x56f   : > { %v1324_v1 = vadd.f32 %v1234_v39, %v3488_v22 }
 0x570   : > { %v1329_v5 = vmul.f32 0.70710677, %v1323_v26 }
 0x571   : > { %v1330_v41 = vmul.f32 0.70710677, %v1324_v1  ;;  %v3720_v1 = vld [vmem:[#allocation2 + $0x90] sm:$0xff] }
 0x572   : > { %v3632_v32 = vsel %vm3232_vm6, %v1329_v5, 0.0 }
 0x573   : > { %v3636_v18 = vsel %vm3226_vm5, %v1330_v41, 0.0  ;;  %1347 = vrot.lane.b32.xlu1 %v3632_v32, %s3079_s7 }
 0x574   : > { %1349 = vrot.lane.b32.xlu0 %v3636_v18, %s3079_s7 }
 0x578   : > { %v1271_v19 = vpop.f32.mrb[20].mxu0  ;;  %1380 = vrot.lane.b32.xlu0 %v3636_v18, %s3080_s9 }
 0x579   : > { %v3645_v30 = vadd.f32 %v1271_v19, %v3494_v29  ;;  %v1314_v22 = vpop.f32.mrb[20].mxu1  ;;  %v1273_v13 = vpop.f32.mrb[21].mxu0  ;;  %v1448_v19 = vpack.c.bf16 %v1430_v61, %v1430_v61 }
 0x57a   : > { %v3648_v38 = vadd.f32 %v1314_v22, %v3497_v28  ;;  %v3651_v12 = vadd.f32 %v1273_v13, %v3499_v35  ;;  %v1316_v6 = vpop.f32.mrb[21].mxu1  ;;  %v1275_v47 = vpop.f32.mrb[22].mxu0  ;;  %v1466_v13 = vand.u32 %v1449_v49, %v3365_v8  ;;  %v1434_v49 = vld [vmem:[#allocation2 + $0xe0] sm:$0x1] }
 0x57b   : > { %v3654_v17 = vadd.f32 %v1316_v6, %v3501_v34  ;;  %v1318_v51 = vpop.f32.mrb[22].mxu1  ;;  %v1277_v21 = vpop.f32.mrb[23].mxu0  ;;  %v1325_v29 = vadd.f32 %v1275_v47, %v3528_v46 }
 0x57c   : > { %v1326_v23 = vadd.f32 %v1277_v21, %v3512_v59  ;;  %v1320_v25 = vpop.f32.mrb[23].mxu1  ;;  %1378 = vrot.lane.b32.xlu0 %v3632_v32, %s3080_s9  ;;  %v1327_v59 = vadd.f32 %v1318_v51, %v3537_v55  ;;  %v1463_v21 = vand.u32 %v1448_v19, %v3365_v8 }
 0x57d   : > { %v1328_v28 = vadd.f32 %v1320_v25, %v3519_v45  ;;  %v3670_v31 = vmul.f32 0.70710677, %v1325_v29  ;;  %v1435_v25 = vld [vmem:[#allocation2 + $0xe8] sm:$0x1] }
 0x57e   : > { %v3661_v27 = vmul.f32 0.70710677, %v1326_v23  ;;  %v3687_v46 = vmul.f32 0.70710677, %v1327_v59  ;;  %v1433_v23 = vld [vmem:[#allocation2 + $0xd8] sm:$0x1] }
 0x57f   : > { %v3663_v35 = vmul.f32 0.70710677, %v1328_v28  ;;  %v3685_v45 = vsel %vm3307_vm15, %v3670_v31, 0.0  ;;  %v2798_v59 = vld [vmem:[%s4002_s1 + $0x10] sm:$0xff]  }
 0x580   : > { %v3668_v34 = vsel %vm3269_vm11, %v3661_v27, 0.0  ;;  %v3696_v55 = vsel %vm3323_vm2, %v3687_v46, 0.0 }
 0x581   : > { %v3676_v10 = vsel %vm3281_vm12, %v3663_v35, 0.0  ;;  %1353 = vrot.lane.b32.xlu0 %v3668_v34, %s3079_s7 }
 0x582   : > { %1357 = vrot.lane.b32.xlu1 %v3676_v10, %s3079_s7 }
 0x585   : > { %1388 = vrot.lane.b32.xlu0 %v3676_v10, %s3080_s9 }
 0x586   : > { %1382 = vrot.lane.b32.xlu1 %v3685_v45, %s3080_s9 }
 0x589   : > { %1384 = vrot.lane.b32.xlu0 %v3668_v34, %s3080_s9 }
 0x58a   : > { %1355 = vrot.lane.b32.xlu1 %v3696_v55, %s3079_s7 }
 0x58e   : > { %1351 = vrot.lane.b32.xlu1 %v3685_v45, %s3079_s7  ;;  %s215_s7 = sand.u32 1, %s3057_s19  }
 0x58f   : > { %s2574_s16 = scalar_lea.sflag [#allocation6], %s215_s7 }
 0x592   : > { %1386 = vrot.lane.b32.xlu1 %v3696_v55, %s3080_s9  ;;  %s2654_s9 = sshll.u32 %s215_s7, 2 }
 0x593   : > { %s217_s11 = scalar_lea.vmem [#allocation7], %s2654_s9 }
 0x594   : > { %s2588_s12 = sshll.u32 %s217_s11, 4  ;;  %s3961_s12 = int_to_ptr.vmem [resolvable:$true] %s2588_s12 }
 0x595   : > { %s2999_s17 = scalar_lea.vmem %s3961_s12, 64  ;;  %p3006_p12 = scmp.lt.s32.totalorder %s3961_s12, %s3004_s23 }
 0x596   : > { %p3000_p5 = scmp.ne.s32.totalorder %s3961_s12, %s2999_s17  ;;  %p3007_p2 = scmp.lt.s32.totalorder %s3005_s25, %s2999_s17 }
 0x598   : > { %p3001_p9 = pnand %p3000_p5, %p4048_p6  ;;  %p3008_p3 = por %p3007_p2, %p3006_p12 }
 0x59a   : > { %p3002_p10 = pneg %p3001_p9 }
 0x59c   : > { %p3009_p4 = pnand %p3008_p3, %p3002_p10 }
 0x5e5   : > { %v1348_v14 = vpop.permute.xlu1 %1347 }
 0x5e6   : > { %v1350_v2 = vpop.permute.xlu0 %1349 }
 0x5e7   : > { %v1364_v36 = vsel %vm1359_vm4, %v1348_v14, %v1350_v2 }
 0x5e8   : > { %v2936_v42 = vpack.c.bf16 %v1330_v41, %v1364_v36 }
 0x5ea   : > { %v1381_v60 = vpop.permute.xlu0 %1380  ;;  %2937 = vmatprep.subr.msk.bf16.mxu0 %vm3354_vm7, %v2936_v42 }
 0x5ee   : > { %v1379_v44 = vpop.permute.xlu0 %1378 }
 0x5ef   : > { %v1395_v54 = vsel %vm1390_vm8, %v1379_v44, %v1381_v60 }
 0x5f0   : > { %v1442_v47 = vpack.c.bf16 %v3720_v1, %v1395_v54  ;;  %v1453_v54 = vpack.c.bf16 %v1435_v25, %v1435_v25 }
 0x5f3   : > { %v1354_v33 = vpop.permute.xlu0 %1353 }
 0x5f4   : > { %v1358_v58 = vpop.permute.xlu1 %1357 }
 0x5f5   : > { %v1365_v43 = vsel %vm1359_vm4, %v1358_v58, %v1348_v14  ;;  %v1432_v14 = vld [vmem:[#allocation2 + $0xd0] sm:$0x1] }
 0x5f6   : > { %v2939_v39 = vpack.c.bf16 %v1329_v5, %v1365_v43  ;;  %v1451_v43 = vpack.c.bf16 %v1433_v23, %v1433_v23  ;;  %v1478_v23 = vand.u32 %v1453_v54, %v3365_v8 }
 0x5f7   : > { %v1389_v6 = vpop.permute.xlu0 %1388 }
 0x5f8   : > { %v1383_v26 = vpop.permute.xlu1 %1382  ;;  %2940 = vmatpush1.bf16.msk.msra.mxu0 %vm3372_vm10, %v2939_v39  ;;  %v1396_v36 = vsel %vm1390_vm8, %v1389_v6, %v1379_v44  ;;  %v3746_v39 = vld [vmem:[#allocation2 + $0xa8] sm:$0xff]  ;;  %v3748_v44 = vld [vmem:[#allocation2 + $0xb0] sm:$0xff] }
 0x5f9   : > { %v1394_v41 = vsel %vm1390_vm8, %v1381_v60, %v1383_v26 }
 0x5fa   : > { %v1443_v22 = vpack.c.bf16 %v3714_v57, %v1394_v41  ;;  %v1450_v41 = vpack.c.bf16 %v1432_v14, %v1432_v14 }
 0x5fb   : > { %v1385_v60 = vpop.permute.xlu0 %1384 }
 0x5fc   : > { %v1356_v51 = vpop.permute.xlu1 %1355  ;;  %1482 = vmatprep.subr.bf16.mxu0 %v1443_v22  ;;  %v3757_v22 = vld [vmem:[#allocation2 + $0xa0] sm:$0xff] }
 0x5fd   : > { %v1360_v5 = vsel %vm1359_vm4, %v1356_v51, %v1358_v58  ;;  %1483 = vmatpush1.bf16.msra.mxu0 %v1442_v47  ;;  %v1361_v29 = vsel %vm1359_vm4, %v1354_v33, %v1356_v51  ;;  %v3741_v58 = vld [vmem:[#allocation2 + $0xb8] sm:$0xff] }
 0x5fe   : > { %1484 = vmatprep.subr.bf16.mxu0 %v1466_v13  ;;  %v2942_v61 = vpack.c.bf16 %v3663_v35, %v1360_v5  ;;  %v1447_v35 = vpack.c.bf16 %v3741_v58, %v1396_v36  ;;  %v1452_v13 = vpack.c.bf16 %v1434_v49, %v1434_v49  ;;  %v1472_v5 = vand.u32 %v1451_v43, %v3365_v8 }
 0x600   : > { %v1352_v28 = vpop.permute.xlu1 %1351  ;;  %v1475_v25 = vand.u32 %v1452_v13, %v3365_v8 }
 0x601   : > { %v1362_v42 = vsel %vm1359_vm4, %v1352_v28, %v1354_v33  ;;  %v1363_v24 = vsel %vm1359_vm4, %v1350_v2, %v1352_v28  ;;  %1485 = vmatpush1.bf16.msra.mxu0 %v1463_v21  ;;  %v1393_v33 = vsel %vm1390_vm8, %v1383_v26, %v1385_v60 }
 0x602   : > { %2943 = vmatprep.subr.msk.bf16.mxu0 %vm3401_vm14, %v2942_v61  ;;  %v2945_v19 = vpack.c.bf16 %v3661_v27, %v1362_v42  ;;  %v2948_v26 = vpack.c.bf16 %v3670_v31, %v1363_v24  ;;  %v2951_v27 = vpack.c.bf16 %v3687_v46, %v1361_v29  ;;  %v1444_v31 = vpack.c.bf16 %v3757_v22, %v1393_v33 }
 0x603   : > { %v1469_v46 = vand.u32 %v1450_v41, %v3365_v8 }
 0x604   : > { %v1387_v2 = vpop.permute.xlu1 %1386  ;;  %2687 = vmatmul.mubr.msk.bf16.vlgmr.msra.gmra.mrb[24].mxu0 %vm449_vm13, %v2798_v59  ;;  %2946 = vmatprep.subr.msk.bf16.mxu1 %vm3414_vm0, %v2945_v19 }
 0x605   : > { %v1391_v47 = vsel %vm1390_vm8, %v1387_v2, %v1389_v6  ;;  %v1392_v51 = vsel %vm1390_vm8, %v1385_v60, %v1387_v2  ;;  %2949 = vmatpush1.bf16.msk.msra.mxu1 %vm3429_vm1, %v2948_v26  ;;  %2952 = vmatpush1.bf16.msk.msra.mxu0 %vm3439_vm3, %v2951_v27 }
 0x606   : > { %1568 = vmatprep.subr.bf16.mxu0 %v1447_v35  ;;  %v1445_v21 = vpack.c.bf16 %v3746_v39, %v1392_v51  ;;  %v1446_v6 = vpack.c.bf16 %v3748_v44, %v1391_v47  ;;  %1598 = vmatprep.mubr.bf16.mxu0 %v3070_v0 }
 0x608   : > { %1525 = vmatprep.subr.bf16.mxu1 %v1445_v21 }
 0x609   : > { %1526 = vmatpush1.bf16.msra.mxu1 %v1444_v31  ;;  %1569 = vmatpush1.bf16.msra.mxu0 %v1446_v6 }
 0x60a   : > { %1527 = vmatprep.subr.bf16.mxu1 %v1472_v5  ;;  %1570 = vmatprep.subr.bf16.mxu0 %v1478_v23  ;;  %v1660_v23 = vld [vmem:[#allocation3 + $0x30] sm:$0x1] }
 0x60d   : > { %1528 = vmatpush1.bf16.msra.mxu1 %v1469_v46  ;;  %1571 = vmatpush1.bf16.msra.mxu0 %v1475_v25  ;;  %v1661_v25 = vld [vmem:[#allocation3 + $0x38] sm:$0x1] }
 0x610   : > { %2688 = vmatmul.mubr.msk.bf16.vlgmr.msra.gmra.mrb[24].mxu1 %vm449_vm13, %v2798_v59  ;;  %2689 = vmatmul.mubr.msk.bf16.vlgmr.msra.gmra.mrb[28].mxu0 %vm449_vm13, %v2798_v59 }
 0x611   : > { %1730 = vmatprep.mubr.bf16.mxu1 %v3070_v0  ;;  %1816 = vmatprep.mubr.bf16.mxu0 %v3070_v0 }
 0x6d7   : > { %v1514_v29 = vpop.f32.mrb[24].mxu0 }
 0x6d8   : > { %v1516_v28 = vpop.f32.mrb[25].mxu0 }
 0x6d9   : > { %v1518_v14 = vpop.f32.mrb[26].mxu0 }
 0x6da   : > { %v1615_v36 = vmul.f32 0.5, %v1518_v14  ;;  %v1520_v60 = vpop.f32.mrb[27].mxu0 }
 0x6db   : > { %v1616_v42 = vmul.f32 0.5, %v1520_v60 }
 0x6dc   : > { %2850 = vtanh.f32 %v1615_v36 }
 0x6dd   : > { %2852 = vtanh.f32 %v1616_v42 }
 0x6de   : > { %2854 = vtanh.f32 %v1514_v29 }
 0x6df   : > { %2856 = vtanh.f32 %v1516_v28 }
 0x6e3   : > { %v1557_v24 = vpop.f32.mrb[24].mxu1  ;;  %v1600_v43 = vpop.f32.mrb[28].mxu0 }
 0x6e4   : > { %v1559_v49 = vpop.f32.mrb[25].mxu1  ;;  %v1602_v61 = vpop.f32.mrb[29].mxu0 }
 0x6e5   : > { %v1561_v54 = vpop.f32.mrb[26].mxu1  ;;  %v1604_v59 = vpop.f32.mrb[30].mxu0 }
 0x6e6   : > { %v2851_v41 = vpop.eup %2850  ;;  %v1617_v33 = vmul.f32 0.5, %v1561_v54  ;;  %v1619_v2 = vmul.f32 0.5, %v1604_v59  ;;  %v1563_v19 = vpop.f32.mrb[27].mxu1  ;;  %v2799_v54 = vld [vmem:[%s4003_s2 + $0x10] sm:$0xff]  }
 0x6e7   : > { %v1606_v35 = vpop.f32.mrb[31].mxu0  ;;  %v2853_v13 = vpop.eup %2852  ;;  %v1627_v47 = vmul.f32 0.5, %v2851_v41  ;;  %v1618_v51 = vmul.f32 0.5, %v1563_v19 }
 0x6e8   : > { %v1620_v26 = vmul.f32 0.5, %v1606_v35  ;;  %v1628_v27 = vmul.f32 0.5, %v2853_v13  ;;  %2858 = vtanh.f32 %v1617_v33  ;;  %v2855_v21 = vpop.eup %2854 }
 0x6e9   : > { %v1633_v5 = vadd.f32 0.5, %v1627_v47  ;;  %2860 = vtanh.f32 %v1619_v2  ;;  %v2857_v31 = vpop.eup %2856 }
 0x6ea   : > { %v1634_v6 = vadd.f32 0.5, %v1628_v27  ;;  %2862 = vtanh.f32 %v1618_v51 }
 0x6eb   : > { %v1639_v46 = vmul.f32 %v2855_v21, %v1633_v5  ;;  %2864 = vtanh.f32 %v1620_v26  ;;  %v1662_v26 = vld [vmem:[#allocation3 + $0x40] sm:$0x1] }
 0x6ec   : > { %v1640_v29 = vmul.f32 %v2857_v31, %v1634_v6  ;;  %2866 = vtanh.f32 %v1557_v24  ;;  %v1663_v6 = vld [vmem:[#allocation3 + $0x48] sm:$0x1] }
 0x6ed   : > { %2868 = vtanh.f32 %v1600_v43  ;;  %v1666_v28 = vpack.c.bf16 %v1660_v23, %v1639_v46  ;;  %v1664_v23 = vld [vmem:[#allocation3 + $0x50] sm:$0x1] }
 0x6ee   : > { %2870 = vtanh.f32 %v1559_v49  ;;  %v1667_v14 = vpack.c.bf16 %v1661_v25, %v1640_v29  ;;  %v1665_v25 = vld [vmem:[#allocation3 + $0x58] sm:$0x1] }
 0x6ef   : > { %2872 = vtanh.f32 %v1602_v61  ;;  %v1681_v60 = vand.u32 %v1666_v28, %v3459_v16 }
 0x6f0   : > { %v1684_v36 = vand.u32 %v1667_v14, %v3459_v16 }
 0x6f2   : > { %v2859_v42 = vpop.eup %2858  ;;  %1698 = vmatprep.subr.bf16.mxu1 %v1684_v36 }
 0x6f3   : > { %v2861_v59 = vpop.eup %2860  ;;  %v1629_v41 = vmul.f32 0.5, %v2859_v42  ;;  %1699 = vmatpush1.bf16.msra.mxu1 %v1681_v60 }
 0x6f4   : > { %v2863_v33 = vpop.eup %2862  ;;  %v1631_v24 = vmul.f32 0.5, %v2861_v59 }
 0x6f5   : > { %v2865_v43 = vpop.eup %2864  ;;  %v1635_v2 = vadd.f32 0.5, %v1629_v41  ;;  %v1630_v49 = vmul.f32 0.5, %v2863_v33 }
 0x6f6   : > { %v2867_v19 = vpop.eup %2866  ;;  %v1637_v61 = vadd.f32 0.5, %v1631_v24  ;;  %v1632_v35 = vmul.f32 0.5, %v2865_v43  ;;  %2693 = vmatmul.mubr.msk.bf16.vlgmr.msra.gmra.mrb[28].mxu1 %vm670_vm9, %v2799_v54 }
 0x6f7   : > { %v2869_v13 = vpop.eup %2868  ;;  %v1641_v47 = vmul.f32 %v2867_v19, %v1635_v2  ;;  %v1636_v51 = vadd.f32 0.5, %v1630_v49  ;;  %1773 = vmatprep.mubr.bf16.mxu1 %v3070_v0 }
 0x6f8   : > { %v2871_v27 = vpop.eup %2870  ;;  %v1643_v5 = vmul.f32 %v2869_v13, %v1637_v61  ;;  %v1638_v21 = vadd.f32 0.5, %v1632_v35 }
 0x6f9   : > { %v2873_v31 = vpop.eup %2872  ;;  %v1642_v46 = vmul.f32 %v2871_v27, %v1636_v51  ;;  %v1668_v28 = vpack.c.bf16 %v1662_v26, %v1641_v47 }
 0x6fa   : > { %v1644_v29 = vmul.f32 %v2873_v31, %v1638_v21  ;;  %v1670_v36 = vpack.c.bf16 %v1664_v23, %v1643_v5 }
 0x6fb   : > { %v1669_v14 = vpack.c.bf16 %v1663_v6, %v1642_v46  ;;  %v1687_v41 = vand.u32 %v1668_v28, %v3459_v16 }
 0x6fc   : > { %v1671_v60 = vpack.c.bf16 %v1665_v25, %v1644_v29  ;;  %v1693_v33 = vand.u32 %v1670_v36, %v3459_v16 }
 0x6fd   : > { %v1690_v42 = vand.u32 %v1669_v14, %v3459_v16 }
 0x6fe   : > { %v1696_v59 = vand.u32 %v1671_v60, %v3459_v16 }
 0x6ff   : > { %1741 = vmatprep.subr.bf16.mxu1 %v1690_v42 }
 0x700   : > { %1784 = vmatprep.subr.bf16.mxu0 %v1696_v59  ;;  %1742 = vmatpush1.bf16.msra.mxu1 %v1687_v41  ;;  %v1935_v59 = vld [vmem:[#allocation2 + $0xc8] sm:$0x1] }
 0x701   : > { %1785 = vmatpush1.bf16.msra.mxu0 %v1693_v33 }
 0x703   : > { %2694 = vmatmul.mubr.msk.bf16.vlgmr.msra.gmra.mrb[32].mxu1 %vm670_vm9, %v2799_v54 }
 0x704   : > { %2695 = vmatmul.mubr.msk.bf16.vlgmr.msra.gmra.mrb[32].mxu0 %vm670_vm9, %v2799_v54  ;;  %2016 = vmatprep.mubr.bf16.mxu1 %v3070_v0 }
 0x705   : > { %2059 = vmatprep.mubr.bf16.mxu0 %v3070_v0 }
 0x7c9   : > { %v1732_v24 = vpop.f32.mrb[28].mxu1 }
 0x7ca   : > { %v3797_v43 = vadd.f32 %v1732_v24, %v3623_v50  ;;  %v1734_v2 = vpop.f32.mrb[29].mxu1  ;;  %v1953_v24 = vpack.c.bf16 %v1935_v59, %v1935_v59 }
 0x7cb   : > { %v3800_v49 = vadd.f32 %v1734_v2, %v3626_v53  ;;  %v1736_v19 = vpop.f32.mrb[30].mxu1  ;;  %v1934_v2 = vld [vmem:[#allocation2 + $0xc0] sm:$0x1] }
 0x7cc   : > { %v1827_v61 = vadd.f32 %v1736_v19, %v3632_v32  ;;  %v1738_v35 = vpop.f32.mrb[31].mxu1 }
 0x7cd   : > { %v1828_v13 = vadd.f32 %v1738_v35, %v3636_v18 }
 0x7ce   : > { %v1833_v47 = vmul.f32 0.70710677, %v1827_v61 }
 0x7cf   : > { %v1834_v54 = vmul.f32 0.70710677, %v1828_v13 }
 0x7d0   : > { %v1839_v51 = vsel %vm3232_vm6, %v1833_v47, 0.0  ;;  %vm1894_vm6 = vcmp.lt.s32.totalorder %v3209_v4, 120 }
 0x7d1   : > { %1851 = vrot.lane.b32.xlu1 %v1839_v51, %s3081_s14  ;;  %v1840_v50 = vsel %vm3226_vm5, %v1834_v54, 0.0  ;;  %vm1863_vm5 = vcmp.lt.s32.totalorder %v3209_v4, 8 }
 0x7d2   : > { %1853 = vrot.lane.b32.xlu0 %v1840_v50, %s3081_s14 }
 0x7d6   : > { %v1775_v53 = vpop.f32.mrb[32].mxu1  ;;  %1884 = vrot.lane.b32.xlu0 %v1840_v50, %s3082_s15  ;;  %v1970_v50 = vand.u32 %v1953_v24, %v3365_v8 }
 0x7d7   : > { %v3812_v32 = vadd.f32 %v1775_v53, %v3645_v30  ;;  %v1818_v18 = vpop.f32.mrb[32].mxu0  ;;  %v1777_v26 = vpop.f32.mrb[33].mxu1 }
 0x7d8   : > { %v3815_v20 = vadd.f32 %v1818_v18, %v3648_v38  ;;  %v3818_v27 = vadd.f32 %v1777_v26, %v3651_v12  ;;  %v1820_v5 = vpop.f32.mrb[33].mxu0  ;;  %v1779_v15 = vpop.f32.mrb[34].mxu1 }
 0x7d9   : > { %v3821_v21 = vadd.f32 %v1820_v5, %v3654_v17  ;;  %v1829_v6 = vadd.f32 %v1779_v15, %v3685_v45  ;;  %v1822_v23 = vpop.f32.mrb[34].mxu0  ;;  %v1781_v31 = vpop.f32.mrb[35].mxu1 }
 0x7da   : > { %v1831_v30 = vadd.f32 %v1822_v23, %v3696_v55  ;;  %v1830_v46 = vadd.f32 %v1781_v31, %v3668_v34  ;;  %v1824_v25 = vpop.f32.mrb[35].mxu0  ;;  %1882 = vrot.lane.b32.xlu0 %v1839_v51, %s3082_s15 }
 0x7db   : > { %v3827_v38 = vmul.f32 0.70710677, %v1829_v6  ;;  %v1832_v12 = vadd.f32 %v1824_v25, %v3676_v10  ;;  %v1939_v6 = vld [vmem:[#allocation2 + $0xe8] sm:$0x1] }
 0x7dc   : > { %v3830_v29 = vmul.f32 0.70710677, %v1831_v30  ;;  %v1836_v28 = vmul.f32 0.70710677, %v1830_v46  ;;  %v1957_v62 = vpack.c.bf16 %v1939_v6, %v1939_v6 }
 0x7dd   : > { %v3832_v17 = vmul.f32 0.70710677, %v1832_v12  ;;  %v1841_v45 = vsel %vm3307_vm15, %v3827_v38, 0.0  ;;  %v1936_v12 = vld [vmem:[#allocation2 + $0xd0] sm:$0x1]  ;;  %vm2354_vm15 = vcmask 64512  }
 0x7de   : > { %v1842_v55 = vsel %vm3269_vm11, %v1836_v28, 0.0  ;;  %v1843_v34 = vsel %vm3323_vm2, %v3830_v29, 0.0  ;;  %vm4042_vm11 = vcmask 1043456  }
 0x7df   : > { %1857 = vrot.lane.b32.xlu0 %v1842_v55, %s3081_s14  ;;  %v1844_v10 = vsel %vm3281_vm12, %v3832_v17, 0.0  ;;  %vm4043_vm12 = vmmov %vm4042_vm11 }
 0x7e0   : > { %1861 = vrot.lane.b32.xlu1 %v1844_v10, %s3081_s14  ;;  %vm4044_vm2 = vmmov %vm4042_vm11 }
 0x7e3   : > { %1888 = vrot.lane.b32.xlu0 %v1842_v55, %s3082_s15 }
 0x7e4   : > { %1886 = vrot.lane.b32.xlu1 %v1841_v45, %s3082_s15 }
 0x7e7   : > { %1892 = vrot.lane.b32.xlu0 %v1844_v10, %s3082_s15 }
 0x7e8   : > { %1855 = vrot.lane.b32.xlu1 %v1841_v45, %s3081_s14  ;;  %v1938_v45 = vld [vmem:[#allocation2 + $0xe0] sm:$0x1] }
 0x7ec   : > { %1859 = vrot.lane.b32.xlu1 %v1843_v34, %s3081_s14 }
 0x7f0   : > { %1890 = vrot.lane.b32.xlu1 %v1843_v34, %s3082_s15  ;;  %s3959_s15 = scalar_lea.hbm %s4006_s5, %s2719_s10 }
 0x843   : > { %v1852_v37 = vpop.permute.xlu1 %1851 }
 0x844   : > { %v1854_v48 = vpop.permute.xlu0 %1853 }
 0x845   : > { %v1868_v40 = vsel %vm1863_vm5, %v1852_v37, %v1854_v48 }
 0x846   : > { %v2954_v14 = vpack.c.bf16 %v1834_v54, %v1868_v40  ;;  %v1952_v54 = vpack.c.bf16 %v1934_v2, %v1934_v2  ;;  %v1956_v40 = vpack.c.bf16 %v1938_v45, %v1938_v45 }
 0x848   : > { %v1885_v52 = vpop.permute.xlu0 %1884  ;;  %2955 = vmatprep.subr.msk.bf16.mxu1 %vm3354_vm7, %v2954_v14  ;;  %v1967_v15 = vand.u32 %v1952_v54, %v3365_v8  ;;  %vm4045_vm7 = vmmov %vm4044_vm2 }
 0x84c   : > { %v1883_v36 = vpop.permute.xlu0 %1882 }
 0x84d   : > { %v1899_v60 = vsel %vm1894_vm6, %v1883_v36, %v1885_v52 }
 0x84e   : > { %v1946_v18 = vpack.c.bf16 %v3720_v1, %v1899_v60  ;;  %v2800_v1 = vld [vmem:[%s4002_s1 + $0x18] sm:$0xff]  }
 0x851   : > { %v1858_v42 = vpop.permute.xlu0 %1857 }
 0x852   : > { %v1862_v41 = vpop.permute.xlu1 %1861 }
 0x853   : > { %v1869_v33 = vsel %vm1863_vm5, %v1862_v41, %v1852_v37  ;;  %v1954_v37 = vpack.c.bf16 %v1936_v12, %v1936_v12 }
 0x854   : > { %v2957_v35 = vpack.c.bf16 %v1833_v47, %v1869_v33 }
 0x855   : > { %v1889_v19 = vpop.permute.xlu0 %1888  ;;  %v1973_v9 = vand.u32 %v1954_v37, %v3365_v8 }
 0x856   : > { %v1887_v61 = vpop.permute.xlu1 %1886  ;;  %2958 = vmatpush1.bf16.msk.msra.mxu1 %vm3372_vm10, %v2957_v35  ;;  %vm4046_vm10 = vmmov %vm4044_vm2 }
 0x857   : > { %v1897_v63 = vsel %vm1894_vm6, %v1887_v61, %v1889_v19  ;;  %v1898_v13 = vsel %vm1894_vm6, %v1885_v52, %v1887_v61  ;;  %v1982_v52 = vand.u32 %v1957_v62, %v3365_v8 }
 0x858   : > { %v1947_v51 = vpack.c.bf16 %v3714_v57, %v1898_v13  ;;  %v1937_v57 = vld [vmem:[#allocation2 + $0xd8] sm:$0x1]  ;;  %v1948_v4 = vpack.c.bf16 %v3757_v22, %v1897_v63 }
 0x859   : > { %v1893_v53 = vpop.permute.xlu0 %1892 }
 0x85a   : > { %v1900_v47 = vsel %vm1894_vm6, %v1893_v53, %v1883_v36  ;;  %v1856_v26 = vpop.permute.xlu1 %1855  ;;  %1986 = vmatprep.subr.bf16.mxu1 %v1947_v51 }
 0x85b   : > { %v1866_v11 = vsel %vm1863_vm5, %v1856_v26, %v1858_v42  ;;  %v1867_v5 = vsel %vm1863_vm5, %v1854_v48, %v1856_v26  ;;  %1987 = vmatpush1.bf16.msra.mxu1 %v1946_v18  ;;  %v1951_v10 = vpack.c.bf16 %v3741_v58, %v1900_v47 }
 0x85c   : > { %1988 = vmatprep.subr.bf16.mxu1 %v1970_v50  ;;  %v2960_v31 = vpack.c.bf16 %v1836_v28, %v1866_v11  ;;  %v2963_v25 = vpack.c.bf16 %v3827_v38, %v1867_v5  ;;  %v1955_v28 = vpack.c.bf16 %v1937_v57, %v1937_v57  ;;  %v2164_v11 = vld [vmem:[#allocation3 + $0x30] sm:$0x1]  ;;  %v2165_v57 = vld [vmem:[#allocation3 + $0x38] sm:$0x1] }
 0x85e   : > { %v1860_v23 = vpop.permute.xlu1 %1859  ;;  %2961 = vmatprep.subr.msk.bf16.mxu0 %vm3414_vm0, %v2960_v31 }
 0x85f   : > { %v1864_v30 = vsel %vm1863_vm5, %v1860_v23, %v1862_v41  ;;  %v1865_v46 = vsel %vm1863_vm5, %v1858_v42, %v1860_v23  ;;  %1989 = vmatpush1.bf16.msra.mxu1 %v1967_v15  ;;  %2964 = vmatpush1.bf16.msk.msra.mxu0 %vm3429_vm1, %v2963_v25  ;;  %v2801_v25 = vld [vmem:[%s4003_s2 + $0x18] sm:$0xff]  }
 0x860   : > { %v2966_v34 = vpack.c.bf16 %v3832_v17, %v1864_v30  ;;  %v2969_v48 = vpack.c.bf16 %v3830_v29, %v1865_v46  ;;  %v1976_v17 = vand.u32 %v1955_v28, %v3365_v8  ;;  %v1979_v29 = vand.u32 %v1956_v40, %v3365_v8 }
 0x862   : > { %v1891_v55 = vpop.permute.xlu1 %1890  ;;  %2699 = vmatmul.mubr.msk.bf16.vlgmr.msra.gmra.mrb[36].mxu1 %vm449_vm13, %v2800_v1  ;;  %2967 = vmatprep.subr.msk.bf16.mxu1 %vm3401_vm14, %v2966_v34  ;;  %vm2570_vm14 = vcmp.lt.s32.totalorder %v238_v3, 512 }
 0x863   : > { %v1895_v38 = vsel %vm1894_vm6, %v1891_v55, %v1893_v53  ;;  %v1896_v7 = vsel %vm1894_vm6, %v1889_v19, %v1891_v55  ;;  %2970 = vmatpush1.bf16.msk.msra.mxu1 %vm3439_vm3, %v2969_v48  ;;  %2102 = vmatprep.mubr.bf16.mxu1 %v3070_v0 }
 0x864   : > { %2072 = vmatprep.subr.bf16.mxu1 %v1951_v10  ;;  %v1949_v56 = vpack.c.bf16 %v3746_v39, %v1896_v7  ;;  %v1950_v58 = vpack.c.bf16 %v3748_v44, %v1895_v38 }
 0x866   : > { %2029 = vmatprep.subr.bf16.mxu0 %v1949_v56 }
 0x867   : > { %2030 = vmatpush1.bf16.msra.mxu0 %v1948_v4  ;;  %2073 = vmatpush1.bf16.msra.mxu1 %v1950_v58  ;;  %v2166_v58 = vld [vmem:[#allocation3 + $0x40] sm:$0x1] }
 0x868   : > { %2031 = vmatprep.subr.bf16.mxu0 %v1976_v17  ;;  %2074 = vmatprep.subr.bf16.mxu1 %v1982_v52 }
 0x86b   : > { %2032 = vmatpush1.bf16.msra.mxu0 %v1973_v9  ;;  %2075 = vmatpush1.bf16.msra.mxu1 %v1979_v29  ;;  %v2167_v9 = vld [vmem:[#allocation3 + $0x48] sm:$0x1]  ;;  %v2168_v29 = vld [vmem:[#allocation3 + $0x50] sm:$0x1] }
 0x86e   : > { %2700 = vmatmul.mubr.msk.bf16.vlgmr.msra.gmra.mrb[36].mxu0 %vm449_vm13, %v2800_v1  ;;  %2701 = vmatmul.mubr.msk.bf16.vlgmr.msra.gmra.mrb[40].mxu1 %vm449_vm13, %v2800_v1  ;;  %vm4047_vm13 = vmmov %vm4044_vm2 }
 0x86f   : > { %2234 = vmatprep.mubr.bf16.mxu0 %v3070_v0  ;;  %2316 = vmatprep.mubr.bf16.mxu1 %v3070_v0 }
 0x935   : > { %v2018_v39 = vpop.f32.mrb[36].mxu1 }
 0x936   : > { %v2020_v44 = vpop.f32.mrb[37].mxu1 }
 0x937   : > { %v2022_v22 = vpop.f32.mrb[38].mxu1 }
 0x938   : > { %v2119_v14 = vmul.f32 0.5, %v2022_v22  ;;  %v2024_v36 = vpop.f32.mrb[39].mxu1  ;;  %v2169_v22 = vld [vmem:[#allocation3 + $0x58] sm:$0x1] }
 0x939   : > { %v2120_v60 = vmul.f32 0.5, %v2024_v36 }
 0x93a   : > { %2874 = vtanh.f32 %v2119_v14 }
 0x93b   : > { %2876 = vtanh.f32 %v2120_v60 }
 0x93c   : > { %2878 = vtanh.f32 %v2018_v39 }
 0x93d   : > { %2880 = vtanh.f32 %v2020_v44 }
 0x941   : > { %v2061_v8 = vpop.f32.mrb[36].mxu0  ;;  %v2104_v42 = vpop.f32.mrb[40].mxu1 }
 0x942   : > { %v2063_v59 = vpop.f32.mrb[37].mxu0  ;;  %v2106_v41 = vpop.f32.mrb[41].mxu1 }
 0x943   : > { %v2065_v33 = vpop.f32.mrb[38].mxu0  ;;  %v2108_v24 = vpop.f32.mrb[42].mxu1 }
 0x944   : > { %v2875_v2 = vpop.eup %2874  ;;  %v2121_v19 = vmul.f32 0.5, %v2065_v33  ;;  %v2123_v61 = vmul.f32 0.5, %v2108_v24  ;;  %v2067_v35 = vpop.f32.mrb[39].mxu0 }
 0x945   : > { %v2110_v63 = vpop.f32.mrb[43].mxu1  ;;  %v2877_v13 = vpop.eup %2876  ;;  %v2131_v54 = vmul.f32 0.5, %v2875_v2  ;;  %v2122_v51 = vmul.f32 0.5, %v2067_v35  ;;  %v3083_v2 = vmov 2  }
 0x946   : > { %v2124_v50 = vmul.f32 0.5, %v2110_v63  ;;  %v2132_v53 = vmul.f32 0.5, %v2877_v13  ;;  %2882 = vtanh.f32 %v2121_v19  ;;  %v2879_v47 = vpop.eup %2878  ;;  %2790 = vset.pattern.permute.xlu1 %v3083_v2  ;;  %v3084_v19 = vmov 3  }
 0x947   : > { %v2137_v18 = vadd.f32 0.5, %v2131_v54  ;;  %2884 = vtanh.f32 %v2123_v61  ;;  %v2881_v5 = vpop.eup %2880  ;;  %2791 = vset.pattern.permute.xlu0 %v3084_v19  ;;  %v2898_v61 = vld [vmem:[%s4005_s4] sm:$0xff] }
 0x948   : > { %v2138_v26 = vadd.f32 0.5, %v2132_v53  ;;  %2886 = vtanh.f32 %v2122_v51  ;;  %2351 = vperm.xlu1 %2790, %v2898_v61   ;;  %2502 = vperm.xlu0 %2791, %v2898_v61  }
 0x949   : > { %v2143_v15 = vmul.f32 %v2879_v47, %v2137_v18  ;;  %2888 = vtanh.f32 %v2124_v50 }
 0x94a   : > { %v2144_v6 = vmul.f32 %v2881_v5, %v2138_v26  ;;  %2890 = vtanh.f32 %v2061_v8 }
 0x94b   : > { %2892 = vtanh.f32 %v2104_v42  ;;  %v2170_v23 = vpack.c.bf16 %v2164_v11, %v2143_v15 }
 0x94c   : > { %2894 = vtanh.f32 %v2063_v59  ;;  %v2171_v31 = vpack.c.bf16 %v2165_v57, %v2144_v6 }
 0x94d   : > { %2896 = vtanh.f32 %v2106_v41  ;;  %v2185_v30 = vand.u32 %v2170_v23, %v3459_v16 }
 0x94e   : > { %v2188_v1 = vand.u32 %v2171_v31, %v3459_v16 }
 0x950   : > { %v2883_v46 = vpop.eup %2882  ;;  %2202 = vmatprep.subr.bf16.mxu0 %v2188_v1 }
 0x951   : > { %v2885_v12 = vpop.eup %2884  ;;  %v2133_v28 = vmul.f32 0.5, %v2883_v46  ;;  %2203 = vmatpush1.bf16.msra.mxu0 %v2185_v30 }
 0x952   : > { %v2887_v62 = vpop.eup %2886  ;;  %v2135_v45 = vmul.f32 0.5, %v2885_v12 }
 0x953   : > { %v2889_v55 = vpop.eup %2888  ;;  %v2139_v34 = vadd.f32 0.5, %v2133_v28  ;;  %v2134_v10 = vmul.f32 0.5, %v2887_v62 }
 0x954   : > { %v2891_v37 = vpop.eup %2890  ;;  %v2141_v38 = vadd.f32 0.5, %v2135_v45  ;;  %v2136_v7 = vmul.f32 0.5, %v2889_v55  ;;  %2705 = vmatmul.mubr.msk.bf16.vlgmr.msra.gmra.mrb[40].mxu0 %vm670_vm9, %v2801_v25 }
 0x955   : > { %v2893_v48 = vpop.eup %2892  ;;  %v2145_v40 = vmul.f32 %v2891_v37, %v2139_v34  ;;  %v2140_v56 = vadd.f32 0.5, %v2134_v10  ;;  %2275 = vmatprep.mubr.bf16.mxu0 %v3070_v0 }
 0x956   : > { %v2895_v17 = vpop.eup %2894  ;;  %v2147_v52 = vmul.f32 %v2893_v48, %v2141_v38  ;;  %v2142_v4 = vadd.f32 0.5, %v2136_v7 }
 0x957   : > { %v2897_v39 = vpop.eup %2896  ;;  %v2146_v44 = vmul.f32 %v2895_v17, %v2140_v56  ;;  %v2172_v36 = vpack.c.bf16 %v2166_v58, %v2145_v40 }
 0x958   : > { %v2148_v14 = vmul.f32 %v2897_v39, %v2142_v4  ;;  %v2174_v8 = vpack.c.bf16 %v2168_v29, %v2147_v52 }
 0x959   : > { %v2173_v60 = vpack.c.bf16 %v2167_v9, %v2146_v44  ;;  %v2191_v33 = vand.u32 %v2172_v36, %v3459_v16 }
 0x95a   : > { %v2175_v42 = vpack.c.bf16 %v2169_v22, %v2148_v14  ;;  %v2197_v24 = vand.u32 %v2174_v8, %v3459_v16 }
 0x95b   : > { %v2194_v59 = vand.u32 %v2173_v60, %v3459_v16 }
 0x95c   : > { %v2200_v41 = vand.u32 %v2175_v42, %v3459_v16  ;;  %v3085_v16 = vmov 4  }
 0x95d   : > { %2243 = vmatprep.subr.bf16.mxu0 %v2194_v59  ;;  %2792 = vset.pattern.permute.xlu1 %v3085_v16 }
 0x95e   : > { %2284 = vmatprep.subr.bf16.mxu1 %v2200_v41  ;;  %2244 = vmatpush1.bf16.msra.mxu0 %v2191_v33 }
 0x95f   : > { %2285 = vmatpush1.bf16.msra.mxu1 %v2197_v24  ;;  %2793 = vset.pattern.permute.xlu0 %v3085_v16 }
 0x960   : > { %2534 = vperm.xlu1 %2792, %v2898_v61  }
 0x961   : > { %2706 = vmatmul.mubr.msk.bf16.vlgmr.msra.gmra.mrb[44].mxu0 %vm670_vm9, %v2801_v25 }
 0x962   : > { %2707 = vmatmul.mubr.msk.bf16.vlgmr.msra.gmra.mrb[44].mxu1 %vm670_vm9, %v2801_v25  ;;  %2408 = vmatprep.mubr.bf16.mxu0 %v3070_v0 }
 0x963   : > { %2448 = vmatprep.mubr.bf16.mxu1 %v3070_v0 }
 0x9c7   : > { %v2503_v9 = vpop.permute.xlu0 %2502 }
 0xa27   : > { %v2236_v35 = vpop.f32.mrb[40].mxu0 }
 0xa28   : > { %v2325_v63 = vadd.f32 %v2236_v35, %v3797_v43  ;;  %v2238_v13 = vpop.f32.mrb[41].mxu0  ;;  %v2343_v43 = vld [vmem:[%s4004_s3] sm:$0xf] }
 0xa29   : > { %v2326_v54 = vadd.f32 %v2238_v13, %v3800_v49  ;;  %v2240_v51 = vpop.f32.mrb[42].mxu0 }
 0xa2a   : > { %v2331_v50 = vmul.f32 0.5, %v2325_v63  ;;  %v2241_v53 = vpop.f32.mrb[43].mxu0 }
 0xa2b   : > { %v2332_v18 = vmul.f32 0.5, %v2326_v54 }
 0xa2c   : > { %v2337_v47 = vmax.f32 %v2331_v50, 0.0 }
 0xa2d   : > { %v2338_v26 = vmax.f32 %v2332_v18, 0.0 }
 0xa2e   : > { %v2344_v11 = vpack.c.bf16 %v2337_v47, %v2337_v47 }
 0xa2f   : > { %v2345_v5 = vpack.c.bf16 %v2338_v26, %v2338_v26 }
 0xa30   : > { %v2359_v15 = vsel %vm4042_vm11, %v2344_v11, 0 }
 0xa31   : > { %2708 = vmatprep.subr.msk.bf16.mxu0 %vm4043_vm12, %v2345_v5 }
 0xa32   : > { %2377 = vmatpush1.bf16.msra.mxu0 %v2359_v15 }
 0xa34   : > { %v2277_v57 = vpop.f32.mrb[44].mxu0 }
 0xa35   : > { %v2327_v49 = vadd.f32 %v2277_v57, %v3812_v32  ;;  %v2318_v6 = vpop.f32.mrb[44].mxu1  ;;  %v2279_v23 = vpop.f32.mrb[45].mxu0  ;;  %2709 = vmatmul.mubr.msk.bf16.vlgmr.msra.gmra.mrb[48].mxu0 %vm2354_vm15, %v2343_v43 }
 0xa36   : > { %v2329_v31 = vadd.f32 %v2318_v6, %v3815_v20  ;;  %v2328_v1 = vadd.f32 %v2279_v23, %v3818_v27  ;;  %v2320_v30 = vpop.f32.mrb[45].mxu1  ;;  %v2281_v46 = vpop.f32.mrb[46].mxu0  ;;  %2489 = vmatprep.mubr.bf16.mxu0 %v3070_v0 }
 0xa37   : > { %v2333_v25 = vmul.f32 0.5, %v2327_v49  ;;  %v2330_v12 = vadd.f32 %v2320_v30, %v3821_v21  ;;  %v2322_v28 = vpop.f32.mrb[46].mxu1  ;;  %v2282_v62 = vpop.f32.mrb[47].mxu0  ;;  %v3086_v49 = vmov 1966171168  }
 0xa38   : > { %v2335_v45 = vmul.f32 0.5, %v2329_v31  ;;  %v2334_v55 = vmul.f32 0.5, %v2328_v1  ;;  %v2323_v32 = vpop.f32.mrb[47].mxu1  ;;  %v2352_v21 = vpop.permute.xlu1 %2351  ;;  %v2548_v6 = vunpack.c.l.s4 %v3086_v49  ;;  %v2551_v28 = vshrl.u32 %v238_v3, 7 }
 0xa39   : > { %v2339_v34 = vmax.f32 %v2333_v25, 0.0  ;;  %v2336_v10 = vmul.f32 0.5, %v2330_v12 }
 0xa3a   : > { %v2341_v37 = vmax.f32 %v2335_v45, 0.0  ;;  %v2340_v38 = vmax.f32 %v2334_v55, 0.0  ;;  %v2549_v12 = vunpack.c.0.s8 %v2548_v6 }
 0xa3b   : > { %v2346_v7 = vpack.c.bf16 %v2339_v34, %v2339_v34  ;;  %v2342_v20 = vmax.f32 %v2336_v10, 0.0 }
 0xa3c   : > { %v2348_v48 = vpack.c.bf16 %v2341_v37, %v2341_v37  ;;  %v2347_v27 = vpack.c.bf16 %v2340_v38, %v2340_v38  ;;  %v2535_v45 = vpop.permute.xlu1 %2534  ;;  %v2552_v38 = vsub.s32 %v2549_v12, %v2551_v28 }
 0xa3d   : > { %v2349_v40 = vpack.c.bf16 %v2342_v20, %v2342_v20  ;;  %v2365_v56 = vsel %vm4044_vm2, %v2346_v7, 0 }
 0xa3e   : > { %2710 = vmatprep.subr.msk.bf16.mxu1 %vm4045_vm7, %v2347_v27  ;;  %v2371_v0 = vsel %vm4046_vm10, %v2348_v48, 0 }
 0xa3f   : > { %2712 = vmatprep.subr.msk.bf16.mxu0 %vm4047_vm13, %v2349_v40  ;;  %2417 = vmatpush1.bf16.msra.mxu1 %v2365_v56 }
 0xa40   : > { %2458 = vmatpush1.bf16.msra.mxu0 %v2371_v0 }
 0xa42   : > { %2711 = vmatmul.mubr.msk.bf16.vlgmr.msra.gmra.mrb[48].mxu1 %vm2354_vm15, %v2343_v43 }
 0xa43   : > { %2713 = vmatmul.mubr.msk.bf16.vlgmr.msra.gmra.mrb[52].mxu0 %vm2354_vm15, %v2343_v43 }
 0xb08   : > { %v2410_v58 = vpop.f32.mrb[48].mxu0 }
 0xb09   : > { %v2411_v17 = vpop.f32.mrb[49].mxu0 }
 0xb0a   : > { %v2412_v52 = vadd.f32 %v2411_v17, %v2352_v21  ;;  %v2413_v4 = vpop.f32.mrb[50].mxu0 }
 0xb0b   : > { %v2414_v29 = vpop.f32.mrb[51].mxu0 }
 0xb0c   : > { %v2497_v39 = vmax.f32 %v2412_v52, 0.0 }
 0xb0e   : > { %v2505_v44 = vmul.f32 %v2503_v9, %v2497_v39 }
 0xb10   : > { %v2509_v22 = vrot.slane %v2505_v44, 4 }
 0xb12   : > { %v2510_v14 = vadd.f32 %v2509_v22, %v2505_v44 }
 0xb14   : > { %v2511_v2 = vrot.slane %v2510_v14, 2 }
 0xb15   : > { %v2450_v36 = vpop.f32.mrb[48].mxu1 }
 0xb16   : > { %v2451_v60 = vadd.f32 %v2450_v36, %v2352_v21  ;;  %v2491_v8 = vpop.f32.mrb[52].mxu0  ;;  %v2452_v42 = vpop.f32.mrb[49].mxu1  ;;  %v2512_v18 = vadd.f32 %v2511_v2, %v2510_v14 }
 0xb17   : > { %v2492_v59 = vadd.f32 %v2491_v8, %v2352_v21  ;;  %v2453_v41 = vadd.f32 %v2452_v42, %v2352_v21  ;;  %v2454_v33 = vpop.f32.mrb[50].mxu1  ;;  %v2493_v24 = vpop.f32.mrb[53].mxu0 }
 0xb18   : > { %v2498_v19 = vmax.f32 %v2451_v60, 0.0  ;;  %v2455_v61 = vpop.f32.mrb[51].mxu1  ;;  %v2494_v16 = vpop.f32.mrb[54].mxu0  ;;  %v2513_v57 = vrot.slane %v2512_v18, 1 }
 0xb19   : > { %v2500_v35 = vmax.f32 %v2492_v59, 0.0  ;;  %v2499_v63 = vmax.f32 %v2453_v41, 0.0  ;;  %v2495_v13 = vpop.f32.mrb[55].mxu0 }
 0xb1a   : > { %v2506_v54 = vmul.f32 %v2503_v9, %v2498_v19  ;;  %v2514_v25 = vadd.f32 %v2513_v57, %v2512_v18 }
 0xb1b   : > { %v2508_v51 = vmul.f32 %v2503_v9, %v2500_v35  ;;  %v2507_v50 = vmul.f32 %v2503_v9, %v2499_v63 }
 0xb1c   : > { %v2515_v53 = vrot.slane %v2506_v54, 4  ;;  %v2537_v7 = vadd.f32 %v2535_v45, %v2514_v25 }
 0xb1d   : > { %v2527_v47 = vrot.slane %v2508_v51, 4  ;;  %v2521_v26 = vrot.slane %v2507_v50, 4 }
 0xb1e   : > { %v2516_v11 = vadd.f32 %v2515_v53, %v2506_v54 }
 0xb1f   : > { %v2528_v5 = vadd.f32 %v2527_v47, %v2508_v51  ;;  %v2522_v15 = vadd.f32 %v2521_v26, %v2507_v50 }
 0xb20   : > { %v2517_v43 = vrot.slane %v2516_v11, 2 }
 0xb21   : > { %v2529_v23 = vrot.slane %v2528_v5, 2  ;;  %v2523_v31 = vrot.slane %v2522_v15, 2 }
 0xb22   : > { %v2518_v1 = vadd.f32 %v2517_v43, %v2516_v11 }
 0xb23   : > { %v2530_v30 = vadd.f32 %v2529_v23, %v2528_v5  ;;  %v2524_v46 = vadd.f32 %v2523_v31, %v2522_v15 }
 0xb24   : > { %v2519_v62 = vrot.slane %v2518_v1, 1 }
 0xb25   : > { %v2525_v55 = vrot.slane %v2524_v46, 1  ;;  %v2531_v32 = vrot.slane %v2530_v30, 1 }
 0xb26   : > { %v2520_v34 = vadd.f32 %v2519_v62, %v2518_v1 }
 0xb27   : > { %v2526_v10 = vadd.f32 %v2525_v55, %v2524_v46  ;;  %v2532_v37 = vadd.f32 %v2531_v32, %v2530_v30 }
 0xb28   : > { %v2538_v20 = vadd.f32 %v2535_v45, %v2520_v34 }
 0xb29   : > { %v2539_v48 = vadd.f32 %v2535_v45, %v2526_v10  ;;  %v2540_v27 = vadd.f32 %v2535_v45, %v2532_v37 }
 0xb2a   : > { %v2545_v40 = vcombine.low %v2537_v7, %v2538_v20 }
 0xb2b   : > { %v2546_v56 = vcombine.low %v2539_v48, %v2540_v27 }
 0xb2c   : > { %v2553_v0 = vrot.slane %v2545_v40, %v2552_v38 }
 0xb2d   : > { %v2560_v21 = vrot.slane %v2546_v56, %v2552_v38 }
 0xb2f   : > { %v2561_v58 = vcombine.low %v2553_v0, %v2560_v21 }
 0xb31   : > { %v2568_v17 = vrot.slane %v2561_v58, %v2552_v38 }
 0xb33   : > { %2572 = vst.msk [vmem:[%s217_s11] sm:$0xf] %vm2570_vm14, %v2568_v17 }
 0xb34   : > { %3012 = shalt.err (!%p3009_p4)
}
 0xb35   : > { %s3013_s26 = scalar_lea.hbm %s3959_s15, 64  ;;  %s3017_s30 = scalar_lea.hbm %s4006_s5, 128 }
 0xb36   : > { %p3014_p7 = scmp.ne.s32.totalorder %s3959_s15, %s3013_s26  ;;  %p3018_p13 = scmp.lt.u32.totalorder %s3959_s15, %s4006_s5 }
 0xb37   : > { %p3019_p1 = scmp.lt.u32.totalorder %s3017_s30, %s3013_s26  ;;  %p3021_p5 = scmp.lt.u32.totalorder %s3013_s26, %s3959_s15 }
 0xb38   : > { %p3015_p8 = pnand %p3014_p7, %p4048_p6 }
 0xb39   : > { %p3020_p0 = por %p3019_p1, %p3018_p13 }
 0xb3a   : > { %p3016_p11 = pneg %p3015_p8 }
 0xb3b   : > { %p3022_p9 = por %p3021_p5, %p3020_p0 }
 0xb3d   : > { %p3023_p10 = pnand %p3022_p9, %p3016_p11 }
 0xb3f   : > { %3026 = shalt.err (!%p3023_p10)
}
 0xb40   : > { %2724 = dma.vmem_to_hbm [thread:$0]  (%p4048_p6), %s3961_s12, 64, %s3959_s15, %s2574_s16  }
 0xb41 PF: > { %p2736_p12 = scmp.ge.s32.totalorder %s3065_s21, 2  ;;  %s2600_s10 = sand.u32 1, %s3053_s18  }
 0xb42   : > { %p4049_p2 = scmp.ne.s32.totalorder %s4012_s29, 0  ;;  %s2601_s11 = scalar_lea.sflag [#allocation6], %s2600_s10 }
 0xb44   : > { %p2731_p3 = pnand %p2736_p12, %p4049_p2 }
 0xb46   : > { %3048 = dma.done.wait (!%p2731_p3), %s2601_s11, 64  }
 0xb47   : > { %3050 = vsyncadd (!%p2731_p3), %s2601_s11, 4294967232  ;;  %p16_p4 = scmp.ge.s32.totalorder %s3143_s24, 4   ;;  %s4050_s18 = smov %s3057_s19 }
 0xb48   : > { %s4051_s19 = smov %s3061_s20  ;;  %s4052_s20 = smov %s3154_s27 }
 0xb49   : > { %s4053_s21 = smov %s3143_s24  ;;  %18 = sbr.rel (!%p16_p4) target bundleno = 4 (0x4), region = 86 }
 0xb50   :  { %2606 = vsyncpa [#allocation5], 1 }
 0xb51   :  { %2608 = vsyncpa [#allocation5 + $0x1], 1 }
 0xb52   :  { %2609 = vsyncpa [#allocation6], 1 }
 0xb53   :  { %2611 = vsyncpa [#allocation6 + $0x1], 1 }

</bundles_post_ra>
